<compile_context>
chip_gen: v7x
topology: tpu7x:2x2x1
jax: 0.10.0
libtpu: 0.0.40
codegen_flags: <defaults>
</compile_context>

<pallas_src>
import functools

import jax
import jax.numpy as jnp
from jax.experimental import pallas as pl
from jax.experimental.pallas import tpu as pltpu

EPS = 1e-5


# ----------------------------------------------------------------------------
# Kernel
# ----------------------------------------------------------------------------
def _make_xcm_kernel(F, T, C, K, NC, B_blk):
    # PyTorch padding='same' (stride 1): left = (K-1)//2, right = K-1-left.
    P_LO = (K - 1) // 2
    P_HI = (K - 1) - P_LO
    F1 = F + 1
    L = T * B_blk                 # lane width of valid-time slab
    Lp = (T + K - 1) * B_blk      # lane width of time-padded slab
    CF = C * F
    KF = K * F
    KF1 = K * F1

    def kernel(x_ref, pg1_ref, pg2_ref, pts_ref, pmisc_ref, pool_ref, o_ref):
        f32 = jnp.float32
        x = x_ref[0]                                             # (F, Lp)

        # ---------------- Stage 1: global_features_learning ----------------
        # (K,1) feature conv as a banded-matrix matmul, 1x1 conv as a
        # block-diagonal matmul (weights precomputed in the wrapper).
        wg1 = pg1_ref[:, 0:F]                                    # (C*F, F)
        sc_g = pg1_ref[:, F:F + 1]                               # (C*F, 1)
        sh_g = pg1_ref[:, F + 1:F + 2]                           # (C*F, 1)
        y = jnp.dot(wg1, x, preferred_element_type=f32)          # (C*F, Lp)
        y = jnp.maximum(y * sc_g + sh_g, 0.0)                    # folded BN2d + ReLU
        wg2 = pg2_ref[:, 0:CF]                                   # (F, C*F)
        bg2 = pg2_ref[:, CF:CF + 1]                              # (F, 1)
        x_g = jnp.maximum(jnp.dot(wg2, y, preferred_element_type=f32) + bg2, 0.0)

        # Zero the per-sample time-pad lanes so stage-3 'same' padding is exact.
        colp = jax.lax.broadcasted_iota(jnp.int32, (1, Lp), 1)
        mask = jnp.logical_and(colp >= P_LO * B_blk,
                               colp < (P_LO + T) * B_blk).astype(f32)
        x_g = x_g * mask                                         # (F, Lp)

        # ---------------- Stage 2: temp_feature_learning ----------------
        # K conv taps fused into one (C, K*F) x (K*F, T*B_blk) contraction.
        wt1 = pts_ref[:, 0:KF]                                   # (C, K*F)
        sc_t = pts_ref[:, KF:KF + 1]
        sh_t = pts_ref[:, KF + 1:KF + 2]
        xw = jnp.concatenate(
            [x[:, dk * B_blk:dk * B_blk + L] for dk in range(K)], axis=0)  # (K*F, L)
        h = jnp.dot(wt1, xw, preferred_element_type=f32)         # (C, L)
        h = jnp.maximum(h * sc_t + sh_t, 0.0)                    # folded BN1d + ReLU
        w_t2 = pmisc_ref[NC:NC + 1, 0:C]                         # (1, C)
        b_t2 = pmisc_ref[NC:NC + 1, C:C + 1]                     # (1, 1)
        x_t = jnp.maximum(jnp.dot(w_t2, h, preferred_element_type=f32) + b_t2, 0.0)

        # Place x_t into a time-padded row (zeros in the pad lanes).
        parts = []
        if P_LO:
            parts.append(jnp.zeros((1, P_LO * B_blk), f32))
        parts.append(x_t)
        if P_HI:
            parts.append(jnp.zeros((1, P_HI * B_blk), f32))
        x_t_row = jnp.concatenate(parts, axis=1) if len(parts) > 1 else x_t  # (1, Lp)

        # ---------------- Stage 3: time_series_learning ----------------
        z = jnp.concatenate([x_g, x_t_row], axis=0)              # (F+1, Lp)
        off = KF + 2
        ws1 = pts_ref[:, off:off + KF1]                          # (C, K*(F+1))
        sc_s = pts_ref[:, off + KF1:off + KF1 + 1]
        sh_s = pts_ref[:, off + KF1 + 1:off + KF1 + 2]
        zw = jnp.concatenate(
            [z[:, dk * B_blk:dk * B_blk + L] for dk in range(K)], axis=0)  # (K*(F+1), L)
        s = jnp.dot(ws1, zw, preferred_element_type=f32)         # (C, L)
        s = jnp.maximum(s * sc_s + sh_s, 0.0)

        # -------- AvgPool over time (matmul) + classifier + softmax --------
        pooled = jnp.dot(s, pool_ref[...], preferred_element_type=f32)      # (C, B_blk)
        w_fc = pmisc_ref[0:NC, 0:C]                              # (NC, C)
        b_fc = pmisc_ref[0:NC, C:C + 1]                          # (NC, 1)
        logits = jnp.dot(w_fc, pooled, preferred_element_type=f32) + b_fc   # (NC, B_blk)
        m = jnp.max(logits, axis=0, keepdims=True)
        e = jnp.exp(logits - m)
        probs = e / jnp.sum(e, axis=0, keepdims=True)
        o_ref[0] = probs.astype(o_ref.dtype)                     # (NC, B_blk)

    return kernel


# ----------------------------------------------------------------------------
# Wrapper-side parameter packing (one-time layout/fold work, all plain XLA)
# ----------------------------------------------------------------------------
def _fold_bn(bn, bias, eps=EPS):
    gamma, beta, mean, var = bn[0], bn[1], bn[2], bn[3]          # each (C, 1)
    scale = gamma * jax.lax.rsqrt(var + eps)
    shift = beta + (bias - mean) * scale
    return scale, shift


def _pack_params(p, *, F, T, C, K, NC, B_blk):
    P_LO = (K - 1) // 2
    F1 = F + 1
    f32 = jnp.float32

    # Stage 1: banded matrix for the (K,1) feature conv (zero padding folded in).
    #   Wg1_big[c*F + f, f2] = w_g1[c, f2 - f + P_LO] if 0 <= f2-f+P_LO < K else 0
    w_g1 = p["w_g1"].astype(f32)                                 # (C, K)
    dk = jnp.arange(F)[None, :] - jnp.arange(F)[:, None] + P_LO  # (F, F)
    band = (dk >= 0) & (dk < K)
    wg1_big = jnp.where(band[None, :, :], w_g1[:, jnp.clip(dk, 0, K - 1)], 0.0)
    wg1_big = wg1_big.reshape(C * F, F)
    sc_g, sh_g = _fold_bn(p["bn_g"].astype(f32), p["b_g1"].astype(f32))
    pg1 = jnp.concatenate([wg1_big,
                           jnp.repeat(sc_g, F, axis=0),
                           jnp.repeat(sh_g, F, axis=0)], axis=1)  # (C*F, F+2)

    # 1x1 conv as block-diagonal matrix: Wg2_big[f, c*F + f'] = w_g2[c] * (f==f')
    w_g2 = p["w_g2"].astype(f32)                                 # (1, C)
    wg2_big = w_g2[0][:, None, None] * jnp.eye(F, dtype=f32)[None, :, :]   # (C, F, F)
    wg2_big = jnp.transpose(wg2_big, (1, 0, 2)).reshape(F, C * F)
    bg2col = jnp.full((F, 1), p["b_g2"][0, 0], f32)
    pg2 = jnp.concatenate([wg2_big, bg2col], axis=1)             # (F, C*F+1)

    # Stage 2/3 conv taps flattened to (C, K*F) / (C, K*(F+1)); BN+bias folded.
    wt1_flat = jnp.transpose(p["w_t1"].astype(f32), (1, 0, 2)).reshape(C, K * F)
    sc_t, sh_t = _fold_bn(p["bn_t"].astype(f32), p["b_t1"].astype(f32))
    ws1_flat = jnp.transpose(p["w_s1"].astype(f32), (1, 0, 2)).reshape(C, K * F1)
    sc_s, sh_s = _fold_bn(p["bn_s"].astype(f32), p["b_s1"].astype(f32))
    pts = jnp.concatenate([wt1_flat, sc_t, sh_t, ws1_flat, sc_s, sh_s], axis=1)

    # Classifier + stage-2 1x1 conv packed together.
    row_fc = jnp.concatenate([p["w_fc"].astype(f32), p["b_fc"].astype(f32)], axis=1)
    row_t2 = jnp.concatenate([p["w_t2"].astype(f32), p["b_t2"].astype(f32)], axis=1)
    pmisc = jnp.concatenate([row_fc, row_t2], axis=0)            # (NC+1, C+1)

    # Pooling matrix: pooled[c, b] = mean_t s[c, t*B_blk + b]
    pool = jnp.tile(jnp.eye(B_blk, dtype=f32), (T, 1)) / T       # (T*B_blk, B_blk)
    return pg1, pg2, pts, pmisc, pool


# ----------------------------------------------------------------------------
# Forward
# ----------------------------------------------------------------------------
@functools.partial(jax.jit, static_argnames=("F", "T", "C", "K", "NC", "B_blk"))
def xcm_forward(x, params, *, F, T, C, K, NC, B_blk=8):
    """Fused XCM forward. x: (B, 1, F, T) -> (B, NC) class probabilities.

    B_blk samples are processed per grid step with batch packed onto the lane
    axis (lane width = T*B_blk; B_blk>=8 for T=16 gives >=128 lanes; 16/32 is
    better on the 256-wide MXU of v6e/v7x if VMEM allows).
    """
    f32 = jnp.float32
    B = x.shape[0]
    P_LO = (K - 1) // 2
    P_HI = (K - 1) - P_LO
    Tp = T + K - 1
    Lp = Tp * B_blk

    # ---- layout plumbing (one-time XLA ops, outside the kernel) ----
    x3 = x.reshape(B, F, T).astype(f32)
    Bpad = ((B + B_blk - 1) // B_blk) * B_blk
    if Bpad != B:
        x3 = jnp.pad(x3, ((0, Bpad - B), (0, 0), (0, 0)))
    nB = Bpad // B_blk
    # per-sample 'same' time padding, then pack batch onto lanes:
    #   x_tp[i, f, tp*B_blk + b] = x[i*B_blk + b, f, tp - P_LO]  (zero in pads)
    x_tp = jnp.pad(x3, ((0, 0), (0, 0), (P_LO, P_HI)))
    x_tp = x_tp.reshape(nB, B_blk, F, Tp).transpose(0, 2, 3, 1).reshape(nB, F, Lp)

    pg1, pg2, pts, pmisc, pool = _pack_params(
        params, F=F, T=T, C=C, K=K, NC=NC, B_blk=B_blk)

    out = pl.pallas_call(
        _make_xcm_kernel(F, T, C, K, NC, B_blk),
        out_shape=jax.ShapeDtypeStruct((nB, NC, B_blk), f32),
        grid_spec=pltpu.PrefetchScalarGridSpec(
            num_scalar_prefetch=0,
            grid=(nB,),
            in_specs=[
                pl.BlockSpec((1, F, Lp), lambda i: (i, 0, 0)),
                pl.BlockSpec(pg1.shape, lambda i: (0, 0)),
                pl.BlockSpec(pg2.shape, lambda i: (0, 0)),
                pl.BlockSpec(pts.shape, lambda i: (0, 0)),
                pl.BlockSpec(pmisc.shape, lambda i: (0, 0)),
                pl.BlockSpec(pool.shape, lambda i: (0, 0)),
            ],
            out_specs=pl.BlockSpec((1, NC, B_blk), lambda i: (i, 0, 0)),
        ),
        compiler_params=pltpu.CompilerParams(
            dimension_semantics=("parallel",),
            vmem_limit_bytes=32 * 1024 * 1024,
        ),
    )(x_tp, pg1, pg2, pts, pmisc, pool)

    # (nB, NC, B_blk) -> (Bpad, NC) -> (B, NC)
    return out.transpose(0, 2, 1).reshape(Bpad, NC)[:B]


# ----------------------------------------------------------------------------
# Parameter init and pure-JAX reference (inference-mode BN semantics)
# ----------------------------------------------------------------------------
def init_xcm_params(key, *, F, T, C, K, NC):
    ks = jax.random.split(key, 24)

    def u(k, shape, scale):
        return jax.random.uniform(k, shape, jnp.float32, -scale, scale)

    def bn_stats(k0, k1, k2, k3, shape):
        return jnp.stack([
            jax.random.uniform(k0, shape, jnp.float32, 0.5, 1.5),  # gamma
            u(k1, shape, 0.1),                                      # beta
            u(k2, shape, 0.1),                                      # running mean
            jax.random.uniform(k3, shape, jnp.float32, 0.5, 1.5),  # running var
        ])

    F1 = F + 1
    p = {}
    p["w_g1"] = u(ks[0], (C, K), 1.0 / (K ** 0.5))
    p["b_g1"] = u(ks[1], (C, 1), 1.0 / (K ** 0.5))
    p["bn_g"] = bn_stats(ks[2], ks[3], ks[4], ks[5], (C, 1))
    p["w_g2"] = u(ks[6], (1, C), 1.0 / (C ** 0.5))
    p["b_g2"] = u(ks[7], (1, 1), 1.0 / (C ** 0.5))
    p["w_t1"] = u(ks[8], (K, C, F), 1.0 / ((F * K) ** 0.5))
    p["b_t1"] = u(ks[9], (C, 1), 1.0 / ((F * K) ** 0.5))
    p["bn_t"] = bn_stats(ks[10], ks[11], ks[12], ks[13], (C, 1))
    p["w_t2"] = u(ks[14], (1, C), 1.0 / (C ** 0.5))
    p["b_t2"] = u(ks[15], (1, 1), 1.0 / (C ** 0.5))
    p["w_s1"] = u(ks[16], (K, C, F1), 1.0 / ((F1 * K) ** 0.5))
    p["b_s1"] = u(ks[17], (C, 1), 1.0 / ((F1 * K) ** 0.5))
    p["bn_s"] = bn_stats(ks[18], ks[19], ks[20], ks[21], (C, 1))
    p["w_fc"] = u(ks[22], (NC, C), 1.0 / (C ** 0.5))
    p["b_fc"] = u(ks[23], (NC, 1), 1.0 / (C ** 0.5))
    return p


def xcm_reference(x, p, *, F, T, C, K, NC, eps=EPS):
    """Pure-JAX reference with identical (inference-mode BN) semantics."""
    hi = jax.lax.Precision.HIGHEST
    B = x.shape[0]
    x2 = x.reshape(B, F, T).astype(jnp.float32)
    p_lo = (K - 1) // 2
    p_hi = (K - 1) - p_lo

    # Stage 1
    xpad = jnp.pad(x2, ((0, 0), (p_lo, p_hi), (0, 0)))
    acc = jnp.zeros((B, C, F, T), jnp.float32)
    for dk in range(K):
        w = p["w_g1"][:, dk][None, :, None, None]
        acc = acc + w * xpad[:, dk:dk + F, :][:, None, :, :]
    acc = acc + p["b_g1"][None, :, :, None]
    gam, bet, mu, var = [p["bn_g"][i][None, :, :, None] for i in range(4)]
    y = jnp.maximum((acc - mu) * (gam * jax.lax.rsqrt(var + eps)) + bet, 0.0)
    x_g = jnp.einsum("oc,bcft->boft", p["w_g2"], y, precision=hi)[:, 0]
    x_g = jnp.maximum(x_g + p["b_g2"][0, 0], 0.0)                      # (B, F, T)

    # Stage 2
    xpt = jnp.pad(x2, ((0, 0), (0, 0), (p_lo, p_hi)))
    h = jnp.zeros((B, C, T), jnp.float32)
    for dk in range(K):
        h = h + jnp.einsum("cf,bft->bct", p["w_t1"][dk], xpt[:, :, dk:dk + T],
                           precision=hi)
    h = h + p["b_t1"][None]
    gam, bet, mu, var = [p["bn_t"][i][None] for i in range(4)]
    h = jnp.maximum((h - mu) * (gam * jax.lax.rsqrt(var + eps)) + bet, 0.0)
    x_t = jnp.einsum("oc,bct->bot", p["w_t2"], h, precision=hi) + p["b_t2"][None]
    x_t = jnp.maximum(x_t, 0.0)                                        # (B, 1, T)

    # Stage 3
    z = jnp.concatenate([x_g, x_t], axis=1)                            # (B, F+1, T)
    zpad = jnp.pad(z, ((0, 0), (0, 0), (p_lo, p_hi)))
    s = jnp.zeros((B, C, T), jnp.float32)
    for dk in range(K):
        s = s + jnp.einsum("cf,bft->bct", p["w_s1"][dk], zpad[:, :, dk:dk + T],
                           precision=hi)
    s = s + p["b_s1"][None]
    gam, bet, mu, var = [p["bn_s"][i][None] for i in range(4)]
    s = jnp.maximum((s - mu) * (gam * jax.lax.rsqrt(var + eps)) + bet, 0.0)

    # Pool + classifier + softmax
    pooled = jnp.mean(s, axis=2)                                       # (B, C)
    logits = jnp.einsum("bc,nc->bn", pooled, p["w_fc"], precision=hi)
    logits = logits + p["b_fc"][:, 0][None]
    return jax.nn.softmax(logits, axis=1)


if __name__ == "__main__":
    # Config consistent with the module:
    #   input_shape = (time_step, features_size) = (16, 8), window_size = 0.2
    #   -> conv kernel K = int(0.2 * 16) = 3 ; filters_num = 32 ; n_class = 4
    # B = 13 exercises both batch padding (13 -> 16) and a 2-step grid.
    B, F, T, C, NC = 13, 8, 16, 32, 4
    window_size = 0.2
    K = int(window_size * T)

    key = jax.random.PRNGKey(0)
    kx, kp = jax.random.split(key)
    x = jax.random.normal(kx, (B, 1, F, T), dtype=jnp.float32)
    params = init_xcm_params(kp, F=F, T=T, C=C, K=K, NC=NC)

    y = xcm_forward(x, params, F=F, T=T, C=C, K=K, NC=NC, B_blk=8)
    y = jax.block_until_ready(y)

    y_ref = jax.block_until_ready(xcm_reference(x, params, F=F, T=T, C=C, K=K, NC=NC))

    assert y.shape == (B, NC), y.shape
    assert jnp.allclose(jnp.sum(y, axis=1), 1.0, atol=1e-3), "softmax rows must sum to 1"
    assert jnp.allclose(y, y_ref, atol=1e-2, rtol=1e-2), (
        "mismatch vs reference, max abs err "
        f"{float(jnp.max(jnp.abs(y - y_ref)))}")

    print("KERNEL_OK")
</pallas_src>

<mosaic_0001>
module attributes {stable_mosaic.version = 11 : i64} {
  func.func @kernel(%arg0: i32, %arg1: memref<1x8x144xf32, #tpu.memory_space<vmem>>, %arg2: memref<256x10xf32, #tpu.memory_space<vmem>>, %arg3: memref<8x257xf32, #tpu.memory_space<vmem>>, %arg4: memref<32x55xf32, #tpu.memory_space<vmem>>, %arg5: memref<5x33xf32, #tpu.memory_space<vmem>>, %arg6: memref<128x8xf32, #tpu.memory_space<vmem>>, %arg7: memref<1x4x8xf32, #tpu.memory_space<vmem>>) attributes {dimension_semantics = [#tpu.dimension_semantics<parallel>], iteration_bounds = array<i64: 2>, scalar_prefetch = 0 : i64, scratch_operands = 0 : i64, tpu.core_type = #tpu.core_type<tc>, window_params = [{transform_indices = @transform_0, window_bounds = array<i64: 1, 8, 144>}, {pipeline_mode = #tpu.pipeline_mode<synchronous>, transform_indices = @transform_1, window_bounds = array<i64: 256, 10>}, {pipeline_mode = #tpu.pipeline_mode<synchronous>, transform_indices = @transform_2, window_bounds = array<i64: 8, 257>}, {pipeline_mode = #tpu.pipeline_mode<synchronous>, transform_indices = @transform_3, window_bounds = array<i64: 32, 55>}, {pipeline_mode = #tpu.pipeline_mode<synchronous>, transform_indices = @transform_4, window_bounds = array<i64: 5, 33>}, {pipeline_mode = #tpu.pipeline_mode<synchronous>, transform_indices = @transform_5, window_bounds = array<i64: 128, 8>}, {transform_indices = @transform_6, window_bounds = array<i64: 1, 4, 8>}]} {
    %c0 = arith.constant 0 : index
    %c0_0 = arith.constant 0 : index
    %c0_1 = arith.constant 0 : index
    %0 = vector.load %arg1[%c0, %c0_0, %c0_1] : memref<1x8x144xf32, #tpu.memory_space<vmem>>, vector<1x8x144xf32>
    %1 = vector.shape_cast %0 : vector<1x8x144xf32> to vector<8x144xf32>
    %c0_2 = arith.constant 0 : index
    %c0_3 = arith.constant 0 : index
    %2 = vector.load %arg2[%c0_2, %c0_3] : memref<256x10xf32, #tpu.memory_space<vmem>>, vector<256x8xf32>
    %c0_4 = arith.constant 0 : index
    %c8 = arith.constant 8 : index
    %3 = vector.load %arg2[%c0_4, %c8] : memref<256x10xf32, #tpu.memory_space<vmem>>, vector<256x1xf32>
    %c0_5 = arith.constant 0 : index
    %c9 = arith.constant 9 : index
    %4 = vector.load %arg2[%c0_5, %c9] : memref<256x10xf32, #tpu.memory_space<vmem>>, vector<256x1xf32>
    %cst = arith.constant dense<0.000000e+00> : vector<256x144xf32>
    %5 = tpu.matmul %2, %1, %cst {dimension_numbers = #tpu.dot_dimension_numbers<[1], [0], [0], [1], [0, 0, 1, 1], [], []>} : vector<256x8xf32>, vector<8x144xf32>, vector<256x144xf32> -> vector<256x144xf32>
    %6 = vector.broadcast %3 : vector<256x1xf32> to vector<256x144xf32>
    %7 = arith.mulf %5, %6 : vector<256x144xf32>
    %8 = vector.broadcast %4 : vector<256x1xf32> to vector<256x144xf32>
    %9 = arith.addf %7, %8 : vector<256x144xf32>
    %cst_6 = arith.constant 0.000000e+00 : f32
    %10 = vector.broadcast %cst_6 : f32 to vector<256x144xf32>
    %11 = arith.maximumf %9, %10 : vector<256x144xf32>
    %c0_7 = arith.constant 0 : index
    %c0_8 = arith.constant 0 : index
    %12 = vector.load %arg3[%c0_7, %c0_8] : memref<8x257xf32, #tpu.memory_space<vmem>>, vector<8x256xf32>
    %c0_9 = arith.constant 0 : index
    %c256 = arith.constant 256 : index
    %13 = vector.load %arg3[%c0_9, %c256] : memref<8x257xf32, #tpu.memory_space<vmem>>, vector<8x1xf32>
    %cst_10 = arith.constant dense<0.000000e+00> : vector<8x144xf32>
    %14 = tpu.matmul %12, %11, %cst_10 {dimension_numbers = #tpu.dot_dimension_numbers<[1], [0], [0], [1], [0, 0, 1, 1], [], []>} : vector<8x256xf32>, vector<256x144xf32>, vector<8x144xf32> -> vector<8x144xf32>
    %15 = vector.broadcast %13 : vector<8x1xf32> to vector<8x144xf32>
    %16 = arith.addf %14, %15 : vector<8x144xf32>
    %cst_11 = arith.constant 0.000000e+00 : f32
    %17 = vector.broadcast %cst_11 : f32 to vector<8x144xf32>
    %18 = arith.maximumf %16, %17 : vector<8x144xf32>
    %19 = tpu.iota {dimensions = array<i32: 1>} : vector<1x144xi32>
    %c8_i32 = arith.constant 8 : i32
    %20 = vector.broadcast %c8_i32 : i32 to vector<1x144xi32>
    %21 = arith.cmpi sge, %19, %20 : vector<1x144xi32>
    %c136_i32 = arith.constant 136 : i32
    %22 = vector.broadcast %c136_i32 : i32 to vector<1x144xi32>
    %23 = arith.cmpi slt, %19, %22 : vector<1x144xi32>
    %24 = arith.andi %21, %23 : vector<1x144xi1>
    %25 = arith.extui %24 : vector<1x144xi1> to vector<1x144xi32>
    %26 = arith.sitofp %25 : vector<1x144xi32> to vector<1x144xf32>
    %27 = vector.broadcast %26 : vector<1x144xf32> to vector<8x144xf32>
    %28 = arith.mulf %18, %27 : vector<8x144xf32>
    %c0_12 = arith.constant 0 : index
    %c0_13 = arith.constant 0 : index
    %29 = vector.load %arg4[%c0_12, %c0_13] : memref<32x55xf32, #tpu.memory_space<vmem>>, vector<32x24xf32>
    %c0_14 = arith.constant 0 : index
    %c24 = arith.constant 24 : index
    %30 = vector.load %arg4[%c0_14, %c24] : memref<32x55xf32, #tpu.memory_space<vmem>>, vector<32x1xf32>
    %c0_15 = arith.constant 0 : index
    %c25 = arith.constant 25 : index
    %31 = vector.load %arg4[%c0_15, %c25] : memref<32x55xf32, #tpu.memory_space<vmem>>, vector<32x1xf32>
    %32 = vector.extract_strided_slice %1 {offsets = [0, 0], sizes = [8, 128], strides = [1, 1]} : vector<8x144xf32> to vector<8x128xf32>
    %33 = vector.extract_strided_slice %1 {offsets = [0, 8], sizes = [8, 128], strides = [1, 1]} : vector<8x144xf32> to vector<8x128xf32>
    %34 = vector.extract_strided_slice %1 {offsets = [0, 16], sizes = [8, 128], strides = [1, 1]} : vector<8x144xf32> to vector<8x128xf32>
    %35 = tpu.concatenate %32, %33, %34 in 0 : vector<8x128xf32>, vector<8x128xf32>, vector<8x128xf32> -> vector<24x128xf32>
    %cst_16 = arith.constant dense<0.000000e+00> : vector<32x128xf32>
    %36 = tpu.matmul %29, %35, %cst_16 {dimension_numbers = #tpu.dot_dimension_numbers<[1], [0], [0], [1], [0, 0, 1, 1], [], []>} : vector<32x24xf32>, vector<24x128xf32>, vector<32x128xf32> -> vector<32x128xf32>
    %37 = vector.broadcast %30 : vector<32x1xf32> to vector<32x128xf32>
    %38 = arith.mulf %36, %37 : vector<32x128xf32>
    %39 = vector.broadcast %31 : vector<32x1xf32> to vector<32x128xf32>
    %40 = arith.addf %38, %39 : vector<32x128xf32>
    %cst_17 = arith.constant 0.000000e+00 : f32
    %41 = vector.broadcast %cst_17 : f32 to vector<32x128xf32>
    %42 = arith.maximumf %40, %41 : vector<32x128xf32>
    %c4 = arith.constant 4 : index
    %c0_18 = arith.constant 0 : index
    %43 = vector.load %arg5[%c4, %c0_18] : memref<5x33xf32, #tpu.memory_space<vmem>>, vector<1x32xf32>
    %c4_19 = arith.constant 4 : index
    %c32 = arith.constant 32 : index
    %44 = vector.load %arg5[%c4_19, %c32] : memref<5x33xf32, #tpu.memory_space<vmem>>, vector<1x1xf32>
    %cst_20 = arith.constant dense<0.000000e+00> : vector<1x128xf32>
    %45 = tpu.matmul %43, %42, %cst_20 {dimension_numbers = #tpu.dot_dimension_numbers<[1], [0], [0], [1], [0, 0, 1, 1], [], []>} : vector<1x32xf32>, vector<32x128xf32>, vector<1x128xf32> -> vector<1x128xf32>
    %46 = vector.broadcast %44 : vector<1x1xf32> to vector<1x128xf32>
    %47 = arith.addf %45, %46 : vector<1x128xf32>
    %cst_21 = arith.constant 0.000000e+00 : f32
    %48 = vector.broadcast %cst_21 : f32 to vector<1x128xf32>
    %49 = arith.maximumf %47, %48 : vector<1x128xf32>
    %cst_22 = arith.constant 0.000000e+00 : f32
    %50 = vector.broadcast %cst_22 : f32 to vector<1x8xf32>
    %cst_23 = arith.constant 0.000000e+00 : f32
    %51 = vector.broadcast %cst_23 : f32 to vector<1x8xf32>
    %52 = tpu.concatenate %50, %49, %51 in 1 : vector<1x8xf32>, vector<1x128xf32>, vector<1x8xf32> -> vector<1x144xf32>
    %53 = tpu.concatenate %28, %52 in 0 : vector<8x144xf32>, vector<1x144xf32> -> vector<9x144xf32>
    %c0_24 = arith.constant 0 : index
    %c26 = arith.constant 26 : index
    %54 = vector.load %arg4[%c0_24, %c26] : memref<32x55xf32, #tpu.memory_space<vmem>>, vector<32x27xf32>
    %c0_25 = arith.constant 0 : index
    %c53 = arith.constant 53 : index
    %55 = vector.load %arg4[%c0_25, %c53] : memref<32x55xf32, #tpu.memory_space<vmem>>, vector<32x1xf32>
    %c0_26 = arith.constant 0 : index
    %c54 = arith.constant 54 : index
    %56 = vector.load %arg4[%c0_26, %c54] : memref<32x55xf32, #tpu.memory_space<vmem>>, vector<32x1xf32>
    %57 = vector.extract_strided_slice %53 {offsets = [0, 0], sizes = [9, 128], strides = [1, 1]} : vector<9x144xf32> to vector<9x128xf32>
    %58 = vector.extract_strided_slice %53 {offsets = [0, 8], sizes = [9, 128], strides = [1, 1]} : vector<9x144xf32> to vector<9x128xf32>
    %59 = vector.extract_strided_slice %53 {offsets = [0, 16], sizes = [9, 128], strides = [1, 1]} : vector<9x144xf32> to vector<9x128xf32>
    %60 = tpu.concatenate %57, %58, %59 in 0 : vector<9x128xf32>, vector<9x128xf32>, vector<9x128xf32> -> vector<27x128xf32>
    %cst_27 = arith.constant dense<0.000000e+00> : vector<32x128xf32>
    %61 = tpu.matmul %54, %60, %cst_27 {dimension_numbers = #tpu.dot_dimension_numbers<[1], [0], [0], [1], [0, 0, 1, 1], [], []>} : vector<32x27xf32>, vector<27x128xf32>, vector<32x128xf32> -> vector<32x128xf32>
    %62 = vector.broadcast %55 : vector<32x1xf32> to vector<32x128xf32>
    %63 = arith.mulf %61, %62 : vector<32x128xf32>
    %64 = vector.broadcast %56 : vector<32x1xf32> to vector<32x128xf32>
    %65 = arith.addf %63, %64 : vector<32x128xf32>
    %cst_28 = arith.constant 0.000000e+00 : f32
    %66 = vector.broadcast %cst_28 : f32 to vector<32x128xf32>
    %67 = arith.maximumf %65, %66 : vector<32x128xf32>
    %c0_29 = arith.constant 0 : index
    %c0_30 = arith.constant 0 : index
    %68 = vector.load %arg6[%c0_29, %c0_30] : memref<128x8xf32, #tpu.memory_space<vmem>>, vector<128x8xf32>
    %cst_31 = arith.constant dense<0.000000e+00> : vector<32x8xf32>
    %69 = tpu.matmul %67, %68, %cst_31 {dimension_numbers = #tpu.dot_dimension_numbers<[1], [0], [0], [1], [0, 0, 1, 1], [], []>} : vector<32x128xf32>, vector<128x8xf32>, vector<32x8xf32> -> vector<32x8xf32>
    %c0_32 = arith.constant 0 : index
    %c0_33 = arith.constant 0 : index
    %70 = vector.load %arg5[%c0_32, %c0_33] : memref<5x33xf32, #tpu.memory_space<vmem>>, vector<4x32xf32>
    %c0_34 = arith.constant 0 : index
    %c32_35 = arith.constant 32 : index
    %71 = vector.load %arg5[%c0_34, %c32_35] : memref<5x33xf32, #tpu.memory_space<vmem>>, vector<4x1xf32>
    %cst_36 = arith.constant dense<0.000000e+00> : vector<4x8xf32>
    %72 = tpu.matmul %70, %69, %cst_36 {dimension_numbers = #tpu.dot_dimension_numbers<[1], [0], [0], [1], [0, 0, 1, 1], [], []>} : vector<4x32xf32>, vector<32x8xf32>, vector<4x8xf32> -> vector<4x8xf32>
    %73 = vector.broadcast %71 : vector<4x1xf32> to vector<4x8xf32>
    %74 = arith.addf %72, %73 : vector<4x8xf32>
    %cst_37 = arith.constant dense<0xFF800000> : vector<8xf32>
    %75 = vector.multi_reduction <maximumf>, %74, %cst_37 [0] : vector<4x8xf32> to vector<8xf32>
    %76 = vector.shape_cast %75 : vector<8xf32> to vector<1x8xf32>
    %77 = vector.broadcast %76 : vector<1x8xf32> to vector<4x8xf32>
    %78 = arith.subf %74, %77 : vector<4x8xf32>
    %79 = math.exp %78 : vector<4x8xf32>
    %cst_38 = arith.constant dense<0.000000e+00> : vector<8xf32>
    %80 = vector.multi_reduction <add>, %79, %cst_38 [0] : vector<4x8xf32> to vector<8xf32>
    %81 = vector.shape_cast %80 : vector<8xf32> to vector<1x8xf32>
    %82 = vector.broadcast %81 : vector<1x8xf32> to vector<4x8xf32>
    %83 = arith.divf %79, %82 : vector<4x8xf32>
    %c0_39 = arith.constant 0 : index
    %c0_40 = arith.constant 0 : index
    %c0_41 = arith.constant 0 : index
    %84 = vector.load %arg7[%c0_39, %c0_40, %c0_41] : memref<1x4x8xf32, #tpu.memory_space<vmem>>, vector<1x4x8xf32>
    %85 = vector.shape_cast %84 : vector<1x4x8xf32> to vector<4x8xf32>
    %86 = vector.shape_cast %83 : vector<4x8xf32> to vector<1x4x8xf32>
    tpu.vector_store %arg7[%c0_39, %c0_40, %c0_41], %86 {strides = array<i32>} : memref<1x4x8xf32, #tpu.memory_space<vmem>>, vector<1x4x8xf32>,
    return
  }
  func.func @transform_0(%arg0: i32) -> (i32, i32, i32) {
    %c0_i32 = arith.constant 0 : i32
    %c0_i32_0 = arith.constant 0 : i32
    %c0_i32_1 = arith.constant 0 : i32
    return %arg0, %c0_i32, %c0_i32_0 : i32, i32, i32
  }
  func.func @transform_1(%arg0: i32) -> (i32, i32) {
    %c0_i32 = arith.constant 0 : i32
    %c0_i32_0 = arith.constant 0 : i32
    %c0_i32_1 = arith.constant 0 : i32
    return %c0_i32, %c0_i32_0 : i32, i32
  }
  func.func @transform_2(%arg0: i32) -> (i32, i32) {
    %c0_i32 = arith.constant 0 : i32
    %c0_i32_0 = arith.constant 0 : i32
    %c0_i32_1 = arith.constant 0 : i32
    return %c0_i32, %c0_i32_0 : i32, i32
  }
  func.func @transform_3(%arg0: i32) -> (i32, i32) {
    %c0_i32 = arith.constant 0 : i32
    %c0_i32_0 = arith.constant 0 : i32
    %c0_i32_1 = arith.constant 0 : i32
    return %c0_i32, %c0_i32_0 : i32, i32
  }
  func.func @transform_4(%arg0: i32) -> (i32, i32) {
    %c0_i32 = arith.constant 0 : i32
    %c0_i32_0 = arith.constant 0 : i32
    %c0_i32_1 = arith.constant 0 : i32
    return %c0_i32, %c0_i32_0 : i32, i32
  }
  func.func @transform_5(%arg0: i32) -> (i32, i32) {
    %c0_i32 = arith.constant 0 : i32
    %c0_i32_0 = arith.constant 0 : i32
    %c0_i32_1 = arith.constant 0 : i32
    return %c0_i32, %c0_i32_0 : i32, i32
  }
  func.func @transform_6(%arg0: i32) -> (i32, i32, i32) {
    %c0_i32 = arith.constant 0 : i32
    %c0_i32_0 = arith.constant 0 : i32
    %c0_i32_1 = arith.constant 0 : i32
    return %arg0, %c0_i32, %c0_i32_0 : i32, i32, i32
  }
}

</mosaic_0001>

<bundles_post_ra>
// kernel: xcm_forward.1
= control target key start
LH: loop header
LB: loop body
LE: loop exit
PB: predicated region body
PF: predicated region fallthrough
CT: control target
= control target key end

     0   :  { %s2346_s21 = smov 0   ;;  %s2940_s0 = inlined_call_operand.vmem [shape: f32[2,8,144], index: 0, kind: input, shape index: {}]   ;;  %s2941_s1 = inlined_call_operand.vmem [shape: f32[256,10], index: 1, kind: input, shape index: {}]   ;;  %s2942_s2 = inlined_call_operand.vmem [shape: f32[8,257], index: 2, kind: input, shape index: {}]   ;;  %s2943_s3 = inlined_call_operand.vmem [shape: f32[32,55], index: 3, kind: input, shape index: {}]   ;;  %s2944_s4 = inlined_call_operand.vmem [shape: f32[5,33], index: 4, kind: input, shape index: {}]   ;;  %s2945_s5 = inlined_call_operand.vmem [shape: f32[128,8], index: 5, kind: input, shape index: {}]   ;;  %s2946_s6 = inlined_call_operand.vmem [shape: f32[2,4,8], index: 6, kind: output, shape index: {}]  }
   0x1 LB: > { %s1875_s22 = sadd.s32 4294967295, %s2293_s21   ;;  %p1879_p0 = scmp.ge.s32.totalorder %s2293_s21, 1  ;;  %s2293_s21 = sphi %s2346_s21, %s16_s21  }
   0x2   : > { %p212_p1 = scmp.lt.s32.totalorder %s2293_s21, 3 }
   0x4   : > { %p213_p2 = pnand %p1879_p0, %p212_p1 }
   0x5   : > { %p241_p3 = scmp.lt.s32.totalorder (!%p213_p2), %s1875_s22, 1  ;;  %v2295_v0 = vmov (!%p213_p2), 0.0   ;;  %v252_v1 = vld [vmem:[%s2941_s1] sm:$0xff] (!%p213_p2)  ;;  %v2363_v2 = vld [vmem:[%s2941_s1 + $0x10] sm:$0xff] (!%p213_p2)  ;;  %v2296_v3 = vmov (!%p213_p2), 9   ;;  %vm284_vm0 = vcmask (!%p213_p2), 64512  }
   0x6   : > { %216 = sbr.rel (%p213_p2) target bundleno = 1778 (0x6f2), region = 44  ;;  %445 = vmatprep.mubr.f32.mxu0 (!%p213_p2), %v2295_v0  ;;  %2208 = vset.pattern.permute.xlu1 (!%p213_p2), %v2296_v3  ;;  %v253_v6 = vld [vmem:[%s2941_s1 + $0x8] sm:$0xff] (!%p213_p2)  ;;  %v2387_v7 = vld [vmem:[%s2941_s1 + $0x30] sm:$0xff] (!%p213_p2)  ;;  %v255_v8 = vld [vmem:[%s2941_s1 + $0x18] sm:$0xff] (!%p213_p2)  ;;  %v2297_v9 = vmov (!%p213_p2), 8   ;;  %s2298_s25 = smov (!%p213_p2), 112  }
   0x7   : > { %2210 = vset.pattern.permute.xlu0 (!%p213_p2), %v2296_v3  ;;  %831 = vperm.xlu1 (!%p213_p2), %2208, %v252_v1   ;;  %v2400_v10 = vld [vmem:[%s2941_s1 + $0x50] sm:$0xff] (!%p213_p2)  ;;  %v256_v13 = vld [vmem:[%s2941_s1 + $0x20] sm:$0xff] (!%p213_p2)  ;;  %v257_v16 = vld [vmem:[%s2941_s1 + $0x28] sm:$0xff] (!%p213_p2)  ;;  %s2299_s28 = smov (!%p213_p2), 120   ;;  %vm1192_vm1 = vcmask (!%p213_p2), 982016   ;;  %vm1199_vm2 = vcmask (!%p213_p2), 916480  }
   0x8   : > { %839 = vperm.xlu0 (!%p213_p2), %2210, %v2363_v2   ;;  %v2408_v11 = vld [vmem:[%s2941_s1 + $0x70] sm:$0xff] (!%p213_p2)  ;;  %v259_v17 = vld [vmem:[%s2941_s1 + $0x38] sm:$0xff] (!%p213_p2)  ;;  %v260_v18 = vld [vmem:[%s2941_s1 + $0x40] sm:$0xff] (!%p213_p2)  ;;  %vm1202_vm3 = vcmask (!%p213_p2), 195584   ;;  %vm2305_vm4 = vmmov (!%p213_p2), 0   ;;  %vm1350_vm7 = vcmask (!%p213_p2), 261120  }
   0x9   : > { %v2417_v12 = vld [vmem:[%s2941_s1 + $0x90] sm:$0xff] (!%p213_p2)  ;;  %v261_v19 = vld [vmem:[%s2941_s1 + $0x48] sm:$0xff] (!%p213_p2)  ;;  %v263_v20 = vld [vmem:[%s2941_s1 + $0x58] sm:$0xff] (!%p213_p2)  ;;  %s2307_s24 = smov (!%p213_p2), 8   ;;  %vm1434_vm8 = vcmask (!%p213_p2), 1040384   ;;  %vm1453_vm9 = vcmask (!%p213_p2), 1041408  }
   0xa   : > { %v2429_v14 = vld [vmem:[%s2941_s1 + $0xb0] sm:$0xff] (!%p213_p2)  ;;  %v264_v21 = vld [vmem:[%s2941_s1 + $0x60] sm:$0xff] (!%p213_p2)  ;;  %v265_v22 = vld [vmem:[%s2941_s1 + $0x68] sm:$0xff] (!%p213_p2)  ;;  %vm1481_vm10 = vcmask (!%p213_p2), 220160   ;;  %vm1490_vm11 = vcmask (!%p213_p2), 1042432   ;;  %vm2310_vm12 = vmmov (!%p213_p2), 1  }
   0xb   : > { %835 = vperm.xlu1 (!%p213_p2), %2208, %v253_v6   ;;  %v2437_v15 = vld [vmem:[%s2941_s1 + $0xd0] sm:$0xff] (!%p213_p2)  ;;  %v267_v23 = vld [vmem:[%s2941_s1 + $0x78] sm:$0xff] (!%p213_p2)  ;;  %v268_v24 = vld [vmem:[%s2941_s1 + $0x80] sm:$0xff] (!%p213_p2)  ;;  %vm1801_vm14 = vcmask (!%p213_p2), 60416  }
   0xc   : > { %855 = vperm.xlu0 (!%p213_p2), %2210, %v2387_v7   ;;  %v269_v25 = vld [vmem:[%s2941_s1 + $0x88] sm:$0xff] (!%p213_p2)  ;;  %v271_v27 = vld [vmem:[%s2941_s1 + $0x98] sm:$0xff] (!%p213_p2)  ;;  %v272_v28 = vld [vmem:[%s2941_s1 + $0xa0] sm:$0xff] (!%p213_p2) }
   0xd   : > { %s2948_s22 = smov (!%p241_p3, %s1875_s22), 1  ;;  %v273_v26 = vld [vmem:[%s2941_s1 + $0xa8] sm:$0xff]  ;;  %v275_v31 = vld [vmem:[%s2941_s1 + $0xb8] sm:$0xff]  ;;  %v282_v32 = vld [vmem:[%s2941_s1 + $0xf0] sm:$0xff] }
   0xe   : > { %s1930_s27 = sshll.u32 %s2948_s22, 4  ;;  %v2534_v29 = vld [vmem:[%s2941_s1 + $0xc8] sm:$0xff]  ;;  %v276_v33 = vld [vmem:[%s2941_s1 + $0xc0] sm:$0xff]  ;;  %v279_v34 = vld [vmem:[%s2941_s1 + $0xd8] sm:$0xff]  ;;  %s1882_s14 = sshll.u32 %s2948_s22, 2 }
   0xf   : > { %s2372_s30 = scalar_lea.vmem %s2940_s0, %s1930_s27  ;;  %2209 = vset.pattern.permute.xlu1 %v2297_v9  ;;  %v2547_v30 = vld [vmem:[%s2941_s1 + $0xe8] sm:$0xff]  ;;  %v280_v35 = vld [vmem:[%s2941_s1 + $0xe0] sm:$0xff]  ;;  %v283_v36 = vld [vmem:[%s2941_s1 + $0xf8] sm:$0xff]  ;;  %s249_s17 = scalar_lea.vmem %s2946_s6, %s1882_s14 }
  0x10   : > { %v2375_v4 = vld [vmem:[%s2372_s30 + $0x8] sm:$0xff]  ;;  %v2378_v5 = vld [vmem:[%s2372_s30] sm:$0xff]  ;;  %651 = vperm.xlu1 %2209, %v255_v8   ;;  %871 = vperm.xlu0 %2210, %v2400_v10   ;;  %vm2141_vm13 = vmpackc.low %vm1490_vm11, %vm2310_vm12 }
  0x11   : > { %381 = vmatprep.subr.mxu0 %v2375_v4  ;;  %v2242_v50 = vpack.i.bf16 %v2375_v4, %v2378_v5 }
  0x12   : > { %382 = vmatpush1.msra.mxu0 %v2378_v5 }
  0x13   : > { %1883 = vmatmul.mubr.msk.f32.vlgmr.msra.gmra.mrb[0].mxu0 %vm284_vm0, %v252_v1 }
  0x14   : > { %451 = vmatprep.mubr.f32.mxu0 %v2295_v0  ;;  %2211 = vset.pattern.permute.xlu1 %v2296_v3 }
  0x15   : > { %887 = vperm.xlu0 %2210, %v2408_v11   ;;  %843 = vperm.xlu1 %2211, %v255_v8  }
  0x17   : > { %1884 = vmatmul.mubr.msk.f32.gmra.mrb[2].mxu0 %vm284_vm0, %v253_v6 }
  0x18   : > { %457 = vmatprep.mubr.f32.mxu0 %v2295_v0 }
  0x19   : > { %903 = vperm.xlu0 %2210, %v2417_v12   ;;  %2212 = vset.pattern.permute.xlu1 %v2297_v9 }
  0x1a   : > { %655 = vperm.xlu1 %2212, %v256_v13  }
  0x1b   : > { %1885 = vmatmul.mubr.msk.f32.gmra.mrb[4].mxu0 %vm284_vm0, %v2363_v2 }
  0x1c   : > { %463 = vmatprep.mubr.f32.mxu0 %v2295_v0 }
  0x1d   : > { %919 = vperm.xlu0 %2210, %v2429_v14  }
  0x1e   : > { %2213 = vset.pattern.permute.xlu1 %v2296_v3 }
  0x1f   : > { %1886 = vmatmul.mubr.msk.f32.gmra.mrb[6].mxu0 %vm284_vm0, %v255_v8  ;;  %847 = vperm.xlu1 %2213, %v256_v13  }
  0x20   : > { %469 = vmatprep.mubr.f32.mxu0 %v2295_v0 }
  0x21   : > { %935 = vperm.xlu0 %2210, %v2437_v15  }
  0x23   : > { %1887 = vmatmul.mubr.msk.f32.gmra.mrb[8].mxu0 %vm284_vm0, %v256_v13  ;;  %851 = vperm.xlu1 %2213, %v257_v16  }
  0x24   : > { %475 = vmatprep.mubr.f32.mxu0 %v2295_v0 }
  0x25   : > { %2235 = vset.pattern.permute.xlu0 %v2297_v9 }
  0x26   : > { %639 = vperm.xlu0 %2235, %v252_v1  }
  0x27   : > { %1888 = vmatmul.mubr.msk.f32.gmra.mrb[10].mxu0 %vm284_vm0, %v257_v16  ;;  %2214 = vset.pattern.permute.xlu1 %v2297_v9 }
  0x28   : > { %481 = vmatprep.mubr.f32.mxu0 %v2295_v0  ;;  %667 = vperm.xlu1 %2214, %v259_v17  }
  0x2a   : > { %643 = vperm.xlu0 %2235, %v253_v6  }
  0x2b   : > { %1889 = vmatmul.mubr.msk.f32.gmra.mrb[12].mxu0 %vm284_vm0, %v2387_v7 }
  0x2c   : > { %487 = vmatprep.mubr.f32.mxu0 %v2295_v0  ;;  %2215 = vset.pattern.permute.xlu1 %v2296_v3 }
  0x2d   : > { %859 = vperm.xlu1 %2215, %v259_v17  }
  0x2e   : > { %647 = vperm.xlu0 %2235, %v2363_v2  }
  0x2f   : > { %1890 = vmatmul.mubr.msk.f32.gmra.mrb[14].mxu0 %vm284_vm0, %v259_v17 }
  0x30   : > { %493 = vmatprep.mubr.f32.mxu0 %v2295_v0 }
  0x31   : > { %2216 = vset.pattern.permute.xlu1 %v2297_v9 }
  0x32   : > { %671 = vperm.xlu1 %2216, %v260_v18   ;;  %659 = vperm.xlu0 %2235, %v257_v16  }
  0x33   : > { %1891 = vmatmul.mubr.msk.f32.gmra.mrb[16].mxu0 %vm284_vm0, %v260_v18 }
  0x34   : > { %499 = vmatprep.mubr.f32.mxu0 %v2295_v0 }
  0x36   : > { %2217 = vset.pattern.permute.xlu1 %v2296_v3  ;;  %663 = vperm.xlu0 %2235, %v2387_v7  }
  0x37   : > { %1892 = vmatmul.mubr.msk.f32.gmra.mrb[18].mxu0 %vm284_vm0, %v261_v19  ;;  %863 = vperm.xlu1 %2217, %v260_v18  }
  0x38   : > { %505 = vmatprep.mubr.f32.mxu0 %v2295_v0 }
  0x3a   : > { %675 = vperm.xlu0 %2235, %v261_v19  }
  0x3b   : > { %1893 = vmatmul.mubr.msk.f32.gmra.mrb[20].mxu0 %vm284_vm0, %v2400_v10  ;;  %867 = vperm.xlu1 %2217, %v261_v19  }
  0x3c   : > { %511 = vmatprep.mubr.f32.mxu0 %v2295_v0 }
  0x3e   : > { %679 = vperm.xlu0 %2235, %v2400_v10  }
  0x3f   : > { %1894 = vmatmul.mubr.msk.f32.gmra.mrb[22].mxu0 %vm284_vm0, %v263_v20  ;;  %2218 = vset.pattern.permute.xlu1 %v2297_v9 }
  0x40   : > { %517 = vmatprep.mubr.f32.mxu0 %v2295_v0  ;;  %683 = vperm.xlu1 %2218, %v263_v20  }
  0x42   : > { %691 = vperm.xlu0 %2235, %v265_v22  }
  0x43   : > { %1895 = vmatmul.mubr.msk.f32.gmra.mrb[24].mxu0 %vm284_vm0, %v264_v21 }
  0x44   : > { %523 = vmatprep.mubr.f32.mxu0 %v2295_v0  ;;  %2219 = vset.pattern.permute.xlu1 %v2296_v3 }
  0x45   : > { %875 = vperm.xlu1 %2219, %v263_v20  }
  0x46   : > { %695 = vperm.xlu0 %2235, %v2408_v11  }
  0x47   : > { %1896 = vmatmul.mubr.msk.f32.gmra.mrb[26].mxu0 %vm284_vm0, %v265_v22 }
  0x48   : > { %529 = vmatprep.mubr.f32.mxu0 %v2295_v0 }
  0x49   : > { %2220 = vset.pattern.permute.xlu1 %v2297_v9 }
  0x4a   : > { %687 = vperm.xlu1 %2220, %v264_v21   ;;  %707 = vperm.xlu0 %2235, %v269_v25  }
  0x4b   : > { %1897 = vmatmul.mubr.msk.f32.gmra.mrb[28].mxu0 %vm284_vm0, %v2408_v11 }
  0x4c   : > { %535 = vmatprep.mubr.f32.mxu0 %v2295_v0 }
  0x4e   : > { %2221 = vset.pattern.permute.xlu1 %v2296_v3  ;;  %711 = vperm.xlu0 %2235, %v2417_v12  }
  0x4f   : > { %1898 = vmatmul.mubr.msk.f32.gmra.mrb[30].mxu0 %vm284_vm0, %v267_v23  ;;  %879 = vperm.xlu1 %2221, %v264_v21  }
  0x50   : > { %541 = vmatprep.mubr.f32.mxu0 %v2295_v0 }
  0x52   : > { %723 = vperm.xlu0 %2235, %v273_v26  }
  0x53   : > { %1899 = vmatmul.mubr.msk.f32.gmra.mrb[32].mxu0 %vm284_vm0, %v268_v24  ;;  %883 = vperm.xlu1 %2221, %v265_v22  }
  0x54   : > { %547 = vmatprep.mubr.f32.mxu0 %v2295_v0 }
  0x56   : > { %727 = vperm.xlu0 %2235, %v2429_v14  }
  0x57   : > { %1900 = vmatmul.mubr.msk.f32.gmra.mrb[34].mxu0 %vm284_vm0, %v269_v25  ;;  %2222 = vset.pattern.permute.xlu1 %v2297_v9 }
  0x58   : > { %553 = vmatprep.mubr.f32.mxu0 %v2295_v0  ;;  %699 = vperm.xlu1 %2222, %v267_v23  }
  0x5a   : > { %739 = vperm.xlu0 %2235, %v2534_v29  }
  0x5b   : > { %1901 = vmatmul.mubr.msk.f32.gmra.mrb[36].mxu0 %vm284_vm0, %v2417_v12 }
  0x5c   : > { %559 = vmatprep.mubr.f32.mxu0 %v2295_v0  ;;  %2223 = vset.pattern.permute.xlu1 %v2296_v3 }
  0x5d   : > { %891 = vperm.xlu1 %2223, %v267_v23  }
  0x5e   : > { %743 = vperm.xlu0 %2235, %v2437_v15  }
  0x5f   : > { %1902 = vmatmul.mubr.msk.f32.gmra.mrb[38].mxu0 %vm284_vm0, %v271_v27 }
  0x60   : > { %565 = vmatprep.mubr.f32.mxu0 %v2295_v0 }
  0x61   : > { %2224 = vset.pattern.permute.xlu1 %v2297_v9 }
  0x62   : > { %703 = vperm.xlu1 %2224, %v268_v24   ;;  %755 = vperm.xlu0 %2235, %v2547_v30  }
  0x63   : > { %1903 = vmatmul.mubr.msk.f32.gmra.mrb[40].mxu0 %vm284_vm0, %v272_v28 }
  0x64   : > { %571 = vmatprep.mubr.f32.mxu0 %v2295_v0 }
  0x66   : > { %2225 = vset.pattern.permute.xlu1 %v2296_v3  ;;  %759 = vperm.xlu0 %2235, %v282_v32  }
  0x67   : > { %1904 = vmatmul.mubr.msk.f32.gmra.mrb[42].mxu0 %vm284_vm0, %v273_v26  ;;  %895 = vperm.xlu1 %2225, %v268_v24  }
  0x68   : > { %577 = vmatprep.mubr.f32.mxu0 %v2295_v0 }
  0x6a   : > { %2240 = vset.pattern.permute.xlu0 %v2296_v3 }
  0x6b   : > { %1905 = vmatmul.mubr.msk.f32.gmra.mrb[44].mxu0 %vm284_vm0, %v2429_v14  ;;  %899 = vperm.xlu1 %2225, %v269_v25   ;;  %v1087_v14 = vld [vmem:[%s2942_s2 + $0x8] sm:$0xff] }
  0x6c   : > { %583 = vmatprep.mubr.f32.mxu0 %v2295_v0  ;;  %951 = vperm.xlu0 %2240, %v282_v32  }
  0x6d   : > { %1158 = vmatprep.mubr.f32.mxu1 %v1087_v14 }
  0x6f   : > { %1906 = vmatmul.mubr.msk.f32.gmra.mrb[46].mxu0 %vm284_vm0, %v275_v31  ;;  %2226 = vset.pattern.permute.xlu1 %v2297_v9 }
  0x70   : > { %589 = vmatprep.mubr.f32.mxu0 %v2295_v0  ;;  %715 = vperm.xlu1 %2226, %v271_v27  }
  0x71   : > { %1195 = vrot.lane.b32.xlu0 %v2378_v5, %s2298_s25 }
  0x73   : > { %1907 = vmatmul.mubr.msk.f32.gmra.mrb[48].mxu0 %vm284_vm0, %v276_v33 }
  0x74   : > { %595 = vmatprep.mubr.f32.mxu0 %v2295_v0  ;;  %2227 = vset.pattern.permute.xlu1 %v2296_v3 }
  0x75   : > { %907 = vperm.xlu1 %2227, %v271_v27  }
  0x77   : > { %1908 = vmatmul.mubr.msk.f32.gmra.mrb[50].mxu0 %vm284_vm0, %v2534_v29 }
  0x78   : > { %601 = vmatprep.mubr.f32.mxu0 %v2295_v0 }
  0x79   : > { %2228 = vset.pattern.permute.xlu1 %v2297_v9 }
  0x7a   : > { %719 = vperm.xlu1 %2228, %v272_v28  }
  0x7b   : > { %1909 = vmatmul.mubr.msk.f32.gmra.mrb[52].mxu0 %vm284_vm0, %v2437_v15 }
  0x7c   : > { %607 = vmatprep.mubr.f32.mxu0 %v2295_v0 }
  0x7e   : > { %2229 = vset.pattern.permute.xlu1 %v2296_v3 }
  0x7f   : > { %1910 = vmatmul.mubr.msk.f32.gmra.mrb[54].mxu0 %vm284_vm0, %v279_v34  ;;  %911 = vperm.xlu1 %2229, %v272_v28  }
  0x80   : > { %613 = vmatprep.mubr.f32.mxu0 %v2295_v0 }
  0x83   : > { %1911 = vmatmul.mubr.msk.f32.gmra.mrb[56].mxu0 %vm284_vm0, %v280_v35  ;;  %915 = vperm.xlu1 %2229, %v273_v26  }
  0x84   : > { %619 = vmatprep.mubr.f32.mxu0 %v2295_v0 }
  0x86   : > { %v2598_v37 = vpop.permute.xlu1 %831 }
  0x87   : > { %1912 = vmatmul.mubr.msk.f32.gmra.mrb[58].mxu0 %vm284_vm0, %v2547_v30  ;;  %2230 = vset.pattern.permute.xlu1 %v2297_v9  ;;  %v840_v46 = vpop.permute.xlu0 %839 }
  0x88   : > { %625 = vmatprep.mubr.f32.mxu0 %v2295_v0  ;;  %731 = vperm.xlu1 %2230, %v275_v31  }
  0x8a   : > { %v2602_v38 = vpop.permute.xlu1 %835 }
  0x8b   : > { %1913 = vmatmul.mubr.msk.f32.gmra.mrb[60].mxu0 %vm284_vm0, %v282_v32  ;;  %v2630_v48 = vpop.permute.xlu0 %855 }
  0x8c   : > { %631 = vmatprep.mubr.f32.mxu0 %v2295_v0  ;;  %2231 = vset.pattern.permute.xlu1 %v2296_v3 }
  0x8d   : > { %923 = vperm.xlu1 %2231, %v275_v31  }
  0x8f   : > { %1914 = vmatmul.mubr.msk.f32.gmra.mrb[62].mxu0 %vm284_vm0, %v283_v36  ;;  %v2605_v39 = vpop.permute.xlu1 %651  ;;  %v2637_v51 = vpop.permute.xlu0 %871 }
  0x91   : > { %2232 = vset.pattern.permute.xlu1 %v2297_v9 }
  0x92   : > { %735 = vperm.xlu1 %2232, %v276_v33  }
  0x94   : > { %v2608_v40 = vpop.permute.xlu1 %843  ;;  %v2642_v53 = vpop.permute.xlu0 %887 }
  0x96   : > { %2233 = vset.pattern.permute.xlu1 %v2296_v3 }
  0x97   : > { %927 = vperm.xlu1 %2233, %v276_v33  }
  0x98   : > { %v2648_v55 = vpop.permute.xlu0 %903 }
  0x99   : > { %v2611_v41 = vpop.permute.xlu1 %655 }
  0x9b   : > { %931 = vperm.xlu1 %2233, %v2534_v29  }
  0x9c   : > { %v2652_v57 = vpop.permute.xlu0 %919 }
  0x9e   : > { %v2614_v42 = vpop.permute.xlu1 %847 }
  0x9f   : > { %2234 = vset.pattern.permute.xlu1 %v2297_v9 }
  0xa0   : > { %747 = vperm.xlu1 %2234, %v279_v34   ;;  %v2656_v59 = vpop.permute.xlu0 %935 }
  0xa2   : > { %v2617_v43 = vpop.permute.xlu1 %851 }
  0xa4   : > { %2236 = vset.pattern.permute.xlu1 %v2296_v3 }
  0xa5   : > { %939 = vperm.xlu1 %2236, %v279_v34   ;;  %v640_v61 = vpop.permute.xlu0 %639 }
  0xa7   : > { %v2620_v44 = vpop.permute.xlu1 %667 }
  0xa9   : > { %2237 = vset.pattern.permute.xlu1 %v2297_v9 }
  0xaa   : > { %751 = vperm.xlu1 %2237, %v280_v35  }
  0xac   : > { %v2624_v45 = vpop.permute.xlu1 %859 }
  0xae   : > { %2238 = vset.pattern.permute.xlu1 %v2296_v3 }
  0xaf   : > { %943 = vperm.xlu1 %2238, %v280_v35  }
  0xb1   : > { %v2627_v47 = vpop.permute.xlu1 %671 }
  0xb3   : > { %947 = vperm.xlu1 %2238, %v2547_v30  }
  0xb6   : > { %v2632_v49 = vpop.permute.xlu1 %863 }
  0xb7   : > { %2239 = vset.pattern.permute.xlu1 %v2297_v9 }
  0xb8   : > { %763 = vperm.xlu1 %2239, %v283_v36  }
  0xba   : > { %v2639_v52 = vpop.permute.xlu1 %867 }
  0xbc   : > { %2241 = vset.pattern.permute.xlu1 %v2296_v3 }
  0xbd   : > { %955 = vperm.xlu1 %2241, %v283_v36  }
  0xbf   : > { %v2644_v54 = vpop.permute.xlu1 %683 }
  0xc1   : > { %2243 = vrot.lane.b32.xlu1 %v2242_v50, %s2299_s28 }
  0xc4   : > { %v2650_v56 = vpop.permute.xlu1 %875 }
  0xc5   : > { %1197 = vrot.lane.b32.xlu1 %v2375_v4, %s2298_s25  ;;  %v644_v4 = vpop.permute.xlu0 %643 }
  0xc9   : > { %v2654_v58 = vpop.permute.xlu1 %687  ;;  %v648_v15 = vpop.permute.xlu0 %647 }
  0xce   : > { %v2658_v60 = vpop.permute.xlu1 %879 }
  0xd2   : > { %v2660_v62 = vpop.permute.xlu1 %883 }
  0xd7   : > { %v2662_v1 = vpop.permute.xlu1 %699 }
  0xdc   : > { %v2666_v12 = vpop.permute.xlu1 %891 }
  0xe1   : > { %v2673_v28 = vpop.permute.xlu1 %703 }
  0xe6   : > { %v447_v63 = vpop.f32.mrb[0].mxu0 }
  0xe7   : > { %v766_v2 = vmul.f32 %v640_v61, %v447_v63  ;;  %v449_v3 = vpop.f32.mrb[1].mxu0 }
  0xe8   : > { %v767_v5 = vmul.f32 %v640_v61, %v449_v3 }
  0xe9   : > { %v958_v7 = vadd.f32 %v2598_v37, %v766_v2 }
  0xea   : > { %v453_v6 = vpop.f32.mrb[2].mxu0  ;;  %v959_v11 = vadd.f32 %v2598_v37, %v767_v5  ;;  %v660_v37 = vpop.permute.xlu0 %659 }
  0xeb   : > { %v768_v8 = vmul.f32 %v644_v4, %v453_v6  ;;  %v455_v9 = vpop.f32.mrb[3].mxu0  ;;  %v1022_v18 = vmax.f32 %v958_v7, 0.0 }
  0xec   : > { %v769_v10 = vmul.f32 %v644_v4, %v455_v9  ;;  %v1023_v23 = vmax.f32 %v959_v11, 0.0  ;;  %v2687_v9 = vld [vmem:[%s2943_s3 + $0x8] sm:$0xff] }
  0xed   : > { %v960_v13 = vadd.f32 %v2602_v38, %v768_v8 }
  0xee   : > { %v459_v16 = vpop.f32.mrb[4].mxu0  ;;  %v961_v17 = vadd.f32 %v2602_v38, %v769_v10  ;;  %v2300_v10 = vmov 24   ;;  %v664_v14 = vpop.permute.xlu0 %663 }
  0xef   : > { %v1024_v19 = vmax.f32 %v960_v13, 0.0  ;;  %v770_v20 = vmul.f32 %v648_v15, %v459_v16  ;;  %v461_v21 = vpop.f32.mrb[5].mxu0  ;;  %2248 = vset.pattern.permute.xlu1 %v2300_v10  ;;  %2247 = vset.pattern.permute.xlu0 %v2300_v10  ;;  %v2693_v13 = vld [vmem:[%s2943_s3] sm:$0xff] }
  0xf0   : > { %v771_v22 = vmul.f32 %v648_v15, %v461_v21  ;;  %v1025_v24 = vmax.f32 %v961_v17, 0.0  ;;  %1305 = vperm.xlu1 %2248, %v2687_v9   ;;  %1301 = vperm.xlu0 %2247, %v2693_v13  }
  0xf1   : > { %v2064_v25 = vpack.c.bf16 %v1024_v19, %v1022_v18  ;;  %v962_v29 = vadd.f32 %v840_v46, %v770_v20 }
  0xf2   : > { %v465_v26 = vpop.f32.mrb[6].mxu0  ;;  %v2062_v27 = vpack.c.bf16 %v1025_v24, %v1023_v23  ;;  %v963_v32 = vadd.f32 %v840_v46, %v771_v22  ;;  %v2681_v46 = vpop.permute.xlu1 %895 }
  0xf3   : > { %v772_v30 = vmul.f32 %v2605_v39, %v465_v26  ;;  %v467_v31 = vpop.f32.mrb[7].mxu0  ;;  %v1026_v38 = vmax.f32 %v962_v29, 0.0 }
  0xf4   : > { %v773_v33 = vmul.f32 %v2605_v39, %v467_v31  ;;  %2063 = vmatprep.subr.bf16.mxu1 %v2062_v27  ;;  %v1027_v2 = vmax.f32 %v963_v32, 0.0 }
  0xf5   : > { %v964_v34 = vadd.f32 %v2608_v40, %v772_v30  ;;  %2065 = vmatpush1.bf16.msra.mxu1 %v2064_v25  ;;  %v2301_v25 = vmov 25  }
  0xf6   : > { %v965_v35 = vadd.f32 %v2608_v40, %v773_v33  ;;  %v471_v36 = vpop.f32.mrb[8].mxu0  ;;  %v2699_v18 = vpop.permute.xlu1 %899  ;;  %2249 = vset.pattern.permute.xlu1 %v2301_v25  ;;  %2250 = vset.pattern.permute.xlu0 %v2301_v25 }
  0xf7   : > { %v1028_v50 = vmax.f32 %v964_v34, 0.0  ;;  %v774_v61 = vmul.f32 %v2611_v41, %v471_v36  ;;  %v473_v63 = vpop.f32.mrb[9].mxu0  ;;  %1321 = vperm.xlu1 %2249, %v2693_v13   ;;  %1325 = vperm.xlu0 %2250, %v2687_v9   ;;  %v2713_v36 = vld [vmem:[%s2943_s3 + $0x10] sm:$0xff] }
  0xf8   : > { %v1029_v3 = vmax.f32 %v965_v35, 0.0  ;;  %v775_v4 = vmul.f32 %v2611_v41, %v473_v63 }
  0xf9   : > { %v2068_v39 = vpack.c.bf16 %v1028_v50, %v1026_v38  ;;  %v966_v7 = vadd.f32 %v2614_v42, %v774_v61 }
  0xfa   : > { %v477_v5 = vpop.f32.mrb[10].mxu0  ;;  %v2066_v6 = vpack.c.bf16 %v1029_v3, %v1027_v2  ;;  %v967_v11 = vadd.f32 %v2614_v42, %v775_v4  ;;  %v2702_v30 = vpop.permute.xlu1 %715 }
  0xfb   : > { %v776_v8 = vmul.f32 %v660_v37, %v477_v5  ;;  %v479_v40 = vpop.f32.mrb[11].mxu0  ;;  %v1030_v42 = vmax.f32 %v966_v7, 0.0  ;;  %2251 = vset.pattern.permute.xlu1 %v2300_v10  ;;  %1329 = vperm.xlu0 %2250, %v2713_v36  }
  0xfc   : > { %v777_v41 = vmul.f32 %v660_v37, %v479_v40  ;;  %2067 = vmatprep.subr.bf16.mxu1 %v2066_v6  ;;  %v1031_v22 = vmax.f32 %v967_v11, 0.0  ;;  %1309 = vperm.xlu1 %2251, %v2713_v36   ;;  %v2730_v6 = vld [vmem:[%s2944_s4 + $0x4] sm:$0x1]  ;;  %v2302_v40 = vmov 32  }
  0xfd   : > { %v968_v15 = vadd.f32 %v2617_v43, %v776_v8  ;;  %2069 = vmatpush1.bf16.msra.mxu1 %v2068_v39 }
  0xfe   : > { %v969_v16 = vadd.f32 %v2617_v43, %v777_v41  ;;  %v483_v17 = vpop.f32.mrb[12].mxu0  ;;  %v2720_v39 = vpop.permute.xlu1 %907 }
  0xff   : > { %v1032_v19 = vmax.f32 %v968_v15, 0.0  ;;  %v778_v20 = vmul.f32 %v664_v14, %v483_v17  ;;  %v485_v21 = vpop.f32.mrb[13].mxu0  ;;  %2253 = vset.pattern.permute.xlu0 %v2302_v40 }
 0x100   : > { %v1033_v23 = vmax.f32 %v969_v16, 0.0  ;;  %v779_v24 = vmul.f32 %v664_v14, %v485_v21  ;;  %1347 = vperm.xlu0 %2253, %v2730_v6  }
 0x101   : > { %v2072_v26 = vpack.c.bf16 %v1032_v19, %v1030_v42  ;;  %v970_v43 = vadd.f32 %v2630_v48, %v778_v20 }
 0x102   : > { %v489_v27 = vpop.f32.mrb[14].mxu0  ;;  %v2070_v29 = vpack.c.bf16 %v1033_v23, %v1031_v22  ;;  %v971_v33 = vadd.f32 %v2630_v48, %v779_v24  ;;  %v676_v48 = vpop.permute.xlu0 %675 }
 0x103   : > { %v780_v31 = vmul.f32 %v2620_v44, %v489_v27  ;;  %v491_v32 = vpop.f32.mrb[15].mxu0  ;;  %v1034_v50 = vmax.f32 %v970_v43, 0.0  ;;  %v2739_v19 = vpop.permute.xlu1 %719 }
 0x104   : > { %v781_v34 = vmul.f32 %v2620_v44, %v491_v32  ;;  %2071 = vmatprep.subr.bf16.mxu1 %v2070_v29  ;;  %v1035_v2 = vmax.f32 %v971_v33, 0.0 }
 0x105   : > { %v972_v35 = vadd.f32 %v2624_v45, %v780_v31  ;;  %2073 = vmatpush1.bf16.msra.mxu1 %v2072_v26 }
 0x106   : > { %v973_v37 = vadd.f32 %v2624_v45, %v781_v34  ;;  %v495_v38 = vpop.f32.mrb[16].mxu0  ;;  %v2725_v45 = vld [vmem:[%s2943_s3 + $0x18] sm:$0xff]  ;;  %v680_v15 = vpop.permute.xlu0 %679  ;;  %v2303_v34 = vmov 0  }
 0x107   : > { %v1036_v44 = vmax.f32 %v972_v35, 0.0  ;;  %v782_v61 = vmul.f32 %v2627_v47, %v495_v38  ;;  %v497_v63 = vpop.f32.mrb[17].mxu0  ;;  %1313 = vperm.xlu1 %2251, %v2725_v45  }
 0x108   : > { %v1037_v3 = vmax.f32 %v973_v37, 0.0  ;;  %v783_v4 = vmul.f32 %v2627_v47, %v497_v63  ;;  %v2749_v37 = vpop.permute.xlu1 %911 }
 0x109   : > { %v2076_v5 = vpack.c.bf16 %v1036_v44, %v1034_v50  ;;  %v974_v47 = vadd.f32 %v2632_v49, %v782_v61 }
 0x10a   : > { %v501_v7 = vpop.f32.mrb[18].mxu0  ;;  %v2074_v8 = vpack.c.bf16 %v1037_v3, %v1035_v2  ;;  %v975_v41 = vadd.f32 %v2632_v49, %v783_v4 }
 0x10b   : > { %v784_v10 = vmul.f32 %v676_v48, %v501_v7  ;;  %v503_v11 = vpop.f32.mrb[19].mxu0  ;;  %2252 = vset.pattern.permute.xlu1 %v2301_v25  ;;  %v1038_v20 = vmax.f32 %v974_v47, 0.0 }
 0x10c   : > { %v785_v14 = vmul.f32 %v676_v48, %v503_v11  ;;  %2075 = vmatprep.subr.bf16.mxu1 %v2074_v8  ;;  %1333 = vperm.xlu1 %2252, %v2725_v45   ;;  %v1039_v24 = vmax.f32 %v975_v41, 0.0  ;;  %v2755_v47 = vpop.permute.xlu1 %915 }
 0x10d   : > { %v976_v16 = vadd.f32 %v2639_v52, %v784_v10  ;;  %2077 = vmatpush1.bf16.msra.mxu1 %v2076_v5 }
 0x10e   : > { %v977_v17 = vadd.f32 %v2639_v52, %v785_v14  ;;  %v507_v42 = vpop.f32.mrb[20].mxu0  ;;  %v1088_v52 = vld [vmem:[%s2942_s2 + $0x10] sm:$0xff] }
 0x10f   : > { %v1040_v21 = vmax.f32 %v976_v16, 0.0  ;;  %v786_v22 = vmul.f32 %v680_v15, %v507_v42  ;;  %v509_v23 = vpop.f32.mrb[21].mxu0 }
 0x110   : > { %v1041_v49 = vmax.f32 %v977_v17, 0.0  ;;  %v787_v26 = vmul.f32 %v680_v15, %v509_v23  ;;  %2254 = vset.pattern.permute.xlu1 %v2303_v34  ;;  %v2761_v42 = vpop.permute.xlu1 %731 }
 0x111   : > { %v978_v27 = vadd.f32 %v2637_v51, %v786_v22  ;;  %v2080_v29 = vpack.c.bf16 %v1040_v21, %v1038_v20  ;;  %1091 = vperm.xlu1 %2254, %v1088_v52  }
 0x112   : > { %v979_v43 = vadd.f32 %v2637_v51, %v787_v26  ;;  %v513_v31 = vpop.f32.mrb[22].mxu0  ;;  %v2078_v25 = vpack.c.bf16 %v1041_v49, %v1039_v24  ;;  %v692_v51 = vpop.permute.xlu0 %691 }
 0x113   : > { %v788_v32 = vmul.f32 %v2644_v54, %v513_v31  ;;  %v515_v33 = vpop.f32.mrb[23].mxu0  ;;  %v1042_v44 = vmax.f32 %v978_v27, 0.0 }
 0x114   : > { %v789_v35 = vmul.f32 %v2644_v54, %v515_v33  ;;  %2079 = vmatprep.subr.bf16.mxu1 %v2078_v25  ;;  %v1043_v3 = vmax.f32 %v979_v43, 0.0 }
 0x115   : > { %v980_v38 = vadd.f32 %v2650_v56, %v788_v32  ;;  %2081 = vmatpush1.bf16.msra.mxu1 %v2080_v29  ;;  %v2767_v32 = vpop.permute.xlu1 %923 }
 0x116   : > { %v981_v48 = vadd.f32 %v2650_v56, %v789_v35  ;;  %v519_v50 = vpop.f32.mrb[24].mxu0  ;;  %v696_v15 = vpop.permute.xlu0 %695 }
 0x117   : > { %v1044_v61 = vmax.f32 %v980_v38, 0.0  ;;  %v790_v63 = vmul.f32 %v2654_v58, %v519_v50  ;;  %v521_v2 = vpop.f32.mrb[25].mxu0 }
 0x118   : > { %v1045_v4 = vmax.f32 %v981_v48, 0.0  ;;  %v791_v54 = vmul.f32 %v2654_v58, %v521_v2 }
 0x119   : > { %v2084_v5 = vpack.c.bf16 %v1044_v61, %v1042_v44  ;;  %v982_v10 = vadd.f32 %v2658_v60, %v790_v63 }
 0x11a   : > { %v525_v7 = vpop.f32.mrb[26].mxu0  ;;  %v2082_v8 = vpack.c.bf16 %v1045_v4, %v1043_v3  ;;  %v983_v41 = vadd.f32 %v2658_v60, %v791_v54  ;;  %v708_v44 = vpop.permute.xlu0 %707 }
 0x11b   : > { %v792_v11 = vmul.f32 %v692_v51, %v525_v7  ;;  %v527_v56 = vpop.f32.mrb[27].mxu0  ;;  %v1046_v20 = vmax.f32 %v982_v10, 0.0  ;;  %v2773_v4 = vpop.permute.xlu1 %735 }
 0x11c   : > { %v793_v14 = vmul.f32 %v692_v51, %v527_v56  ;;  %2083 = vmatprep.subr.bf16.mxu1 %v2082_v8  ;;  %v1047_v24 = vmax.f32 %v983_v41, 0.0 }
 0x11d   : > { %v984_v16 = vadd.f32 %v2660_v62, %v792_v11  ;;  %2085 = vmatpush1.bf16.msra.mxu1 %v2084_v5 }
 0x11e   : > { %v985_v17 = vadd.f32 %v2660_v62, %v793_v14  ;;  %v531_v58 = vpop.f32.mrb[28].mxu0  ;;  %v712_v11 = vpop.permute.xlu0 %711 }
 0x11f   : > { %v1048_v21 = vmax.f32 %v984_v16, 0.0  ;;  %v794_v22 = vmul.f32 %v696_v15, %v531_v58  ;;  %v533_v23 = vpop.f32.mrb[29].mxu0 }
 0x120   : > { %v1049_v49 = vmax.f32 %v985_v17, 0.0  ;;  %v795_v26 = vmul.f32 %v696_v15, %v533_v23 }
 0x121   : > { %v2088_v27 = vpack.c.bf16 %v1048_v21, %v1046_v20  ;;  %v986_v52 = vadd.f32 %v2642_v53, %v794_v22  ;;  %v2779_v21 = vpop.permute.xlu1 %927 }
 0x122   : > { %v537_v60 = vpop.f32.mrb[30].mxu0  ;;  %v2086_v29 = vpack.c.bf16 %v1049_v49, %v1047_v24  ;;  %v987_v62 = vadd.f32 %v2642_v53, %v795_v26 }
 0x123   : > { %v796_v43 = vmul.f32 %v2662_v1, %v537_v60  ;;  %v539_v31 = vpop.f32.mrb[31].mxu0  ;;  %v1050_v38 = vmax.f32 %v986_v52, 0.0 }
 0x124   : > { %v797_v25 = vmul.f32 %v2662_v1, %v539_v31  ;;  %2087 = vmatprep.subr.bf16.mxu1 %v2086_v29  ;;  %v1051_v61 = vmax.f32 %v987_v62, 0.0 }
 0x125   : > { %v988_v33 = vadd.f32 %v2666_v12, %v796_v43  ;;  %2089 = vmatpush1.bf16.msra.mxu1 %v2088_v27  ;;  %v2787_v43 = vpop.permute.xlu1 %931 }
 0x126   : > { %v989_v34 = vadd.f32 %v2666_v12, %v797_v25  ;;  %v543_v35 = vpop.f32.mrb[32].mxu0 }
 0x127   : > { %v1052_v48 = vmax.f32 %v988_v33, 0.0  ;;  %v798_v50 = vmul.f32 %v2673_v28, %v543_v35  ;;  %v545_v51 = vpop.f32.mrb[33].mxu0 }
 0x128   : > { %v1053_v63 = vmax.f32 %v989_v34, 0.0  ;;  %v799_v53 = vmul.f32 %v2673_v28, %v545_v51  ;;  %v724_v34 = vpop.permute.xlu0 %723 }
 0x129   : > { %v2092_v1 = vpack.c.bf16 %v1052_v48, %v1050_v38  ;;  %v990_v54 = vadd.f32 %v2681_v46, %v798_v50  ;;  %v2791_v51 = vpop.permute.xlu1 %747 }
 0x12a   : > { %v549_v2 = vpop.f32.mrb[34].mxu0  ;;  %v2090_v3 = vpack.c.bf16 %v1053_v63, %v1051_v61  ;;  %v991_v7 = vadd.f32 %v2681_v46, %v799_v53 }
 0x12b   : > { %v800_v5 = vmul.f32 %v708_v44, %v549_v2  ;;  %v551_v12 = vpop.f32.mrb[35].mxu0  ;;  %v1054_v41 = vmax.f32 %v990_v54, 0.0 }
 0x12c   : > { %v801_v8 = vmul.f32 %v708_v44, %v551_v12  ;;  %2091 = vmatprep.subr.bf16.mxu1 %v2090_v3  ;;  %v1055_v17 = vmax.f32 %v991_v7, 0.0  ;;  %v728_v2 = vpop.permute.xlu0 %727 }
 0x12d   : > { %v992_v10 = vadd.f32 %v2699_v18, %v800_v5  ;;  %2093 = vmatpush1.bf16.msra.mxu1 %v2092_v1 }
 0x12e   : > { %v993_v56 = vadd.f32 %v2699_v18, %v801_v8  ;;  %v555_v28 = vpop.f32.mrb[36].mxu0 }
 0x12f   : > { %v1056_v14 = vmax.f32 %v992_v10, 0.0  ;;  %v802_v15 = vmul.f32 %v712_v11, %v555_v28  ;;  %v557_v16 = vpop.f32.mrb[37].mxu0 }
 0x130   : > { %v1057_v58 = vmax.f32 %v993_v56, 0.0  ;;  %v803_v20 = vmul.f32 %v712_v11, %v557_v16  ;;  %v940_v56 = vpop.permute.xlu1 %939 }
 0x131   : > { %v2096_v22 = vpack.c.bf16 %v1056_v14, %v1054_v41  ;;  %v994_v24 = vadd.f32 %v2648_v55, %v802_v15 }
 0x132   : > { %v561_v46 = vpop.f32.mrb[38].mxu0  ;;  %v2094_v23 = vpack.c.bf16 %v1057_v58, %v1055_v17  ;;  %v995_v18 = vadd.f32 %v2648_v55, %v803_v20 }
 0x133   : > { %v804_v49 = vmul.f32 %v2702_v30, %v561_v46  ;;  %v563_v26 = vpop.f32.mrb[39].mxu0  ;;  %v1058_v31 = vmax.f32 %v994_v24, 0.0 }
 0x134   : > { %v805_v27 = vmul.f32 %v2702_v30, %v563_v26  ;;  %2095 = vmatprep.subr.bf16.mxu1 %v2094_v23  ;;  %v1059_v35 = vmax.f32 %v995_v18, 0.0  ;;  %v752_v46 = vpop.permute.xlu1 %751  ;;  %v740_v18 = vpop.permute.xlu0 %739 }
 0x135   : > { %v996_v60 = vadd.f32 %v2720_v39, %v804_v49  ;;  %2097 = vmatpush1.bf16.msra.mxu1 %v2096_v22 }
 0x136   : > { %v997_v29 = vadd.f32 %v2720_v39, %v805_v27  ;;  %v567_v52 = vpop.f32.mrb[40].mxu0 }
 0x137   : > { %v1060_v62 = vmax.f32 %v996_v60, 0.0  ;;  %v806_v25 = vmul.f32 %v2739_v19, %v567_v52  ;;  %v569_v33 = vpop.f32.mrb[41].mxu0 }
 0x138   : > { %v1061_v38 = vmax.f32 %v997_v29, 0.0  ;;  %v807_v55 = vmul.f32 %v2739_v19, %v569_v33 }
 0x139   : > { %v2100_v30 = vpack.c.bf16 %v1060_v62, %v1058_v31  ;;  %v998_v39 = vadd.f32 %v2749_v37, %v806_v25 }
 0x13a   : > { %v573_v48 = vpop.f32.mrb[42].mxu0  ;;  %v2098_v50 = vpack.c.bf16 %v1061_v38, %v1059_v35  ;;  %v999_v63 = vadd.f32 %v2749_v37, %v807_v55  ;;  %v744_v38 = vpop.permute.xlu0 %743 }
 0x13b   : > { %v808_v44 = vmul.f32 %v724_v34, %v573_v48  ;;  %v575_v61 = vpop.f32.mrb[43].mxu0  ;;  %v1062_v54 = vmax.f32 %v998_v39, 0.0 }
 0x13c   : > { %v809_v53 = vmul.f32 %v724_v34, %v575_v61  ;;  %2099 = vmatprep.subr.bf16.mxu1 %v2098_v50  ;;  %v1063_v8 = vmax.f32 %v999_v63, 0.0  ;;  %v944_v34 = vpop.permute.xlu1 %943 }
 0x13d   : > { %v1000_v1 = vadd.f32 %v2755_v47, %v808_v44  ;;  %2101 = vmatpush1.bf16.msra.mxu1 %v2100_v30 }
 0x13e   : > { %v1001_v3 = vadd.f32 %v2755_v47, %v809_v53  ;;  %v579_v19 = vpop.f32.mrb[44].mxu0 }
 0x13f   : > { %v1064_v5 = vmax.f32 %v1000_v1, 0.0  ;;  %v810_v12 = vmul.f32 %v728_v2, %v579_v19  ;;  %v581_v7 = vpop.f32.mrb[45].mxu0 }
 0x140   : > { %v1065_v10 = vmax.f32 %v1001_v3, 0.0  ;;  %v811_v11 = vmul.f32 %v728_v2, %v581_v7  ;;  %v948_v2 = vpop.permute.xlu1 %947 }
 0x141   : > { %v2104_v28 = vpack.c.bf16 %v1064_v5, %v1062_v54  ;;  %v1002_v14 = vadd.f32 %v2652_v57, %v810_v12  ;;  %v756_v12 = vpop.permute.xlu0 %755 }
 0x142   : > { %v585_v41 = vpop.f32.mrb[46].mxu0  ;;  %v2102_v37 = vpack.c.bf16 %v1065_v10, %v1063_v8  ;;  %v1003_v17 = vadd.f32 %v2652_v57, %v811_v11 }
 0x143   : > { %v812_v15 = vmul.f32 %v2761_v42, %v585_v41  ;;  %v587_v16 = vpop.f32.mrb[47].mxu0  ;;  %v1066_v23 = vmax.f32 %v1002_v14, 0.0 }
 0x144   : > { %v813_v47 = vmul.f32 %v2761_v42, %v587_v16  ;;  %2103 = vmatprep.subr.bf16.mxu1 %v2102_v37  ;;  %v1067_v27 = vmax.f32 %v1003_v17, 0.0  ;;  %v764_v11 = vpop.permute.xlu1 %763 }
 0x145   : > { %v1004_v58 = vadd.f32 %v2767_v32, %v812_v15  ;;  %2105 = vmatpush1.bf16.msra.mxu1 %v2104_v28 }
 0x146   : > { %v1005_v20 = vadd.f32 %v2767_v32, %v813_v47  ;;  %v591_v22 = vpop.f32.mrb[48].mxu0 }
 0x147   : > { %v1068_v24 = vmax.f32 %v1004_v58, 0.0  ;;  %v814_v49 = vmul.f32 %v2773_v4, %v591_v22  ;;  %v593_v26 = vpop.f32.mrb[49].mxu0 }
 0x148   : > { %v1069_v60 = vmax.f32 %v1005_v20, 0.0  ;;  %v815_v57 = vmul.f32 %v2773_v4, %v593_v26 }
 0x149   : > { %v2108_v29 = vpack.c.bf16 %v1068_v24, %v1066_v23  ;;  %v1006_v31 = vadd.f32 %v2779_v21, %v814_v49  ;;  %v760_v23 = vpop.permute.xlu0 %759 }
 0x14a   : > { %v597_v42 = vpop.f32.mrb[50].mxu0  ;;  %v2106_v52 = vpack.c.bf16 %v1069_v60, %v1067_v27  ;;  %v1007_v32 = vadd.f32 %v2779_v21, %v815_v57 }
 0x14b   : > { %v816_v62 = vmul.f32 %v740_v18, %v597_v42  ;;  %v599_v25 = vpop.f32.mrb[51].mxu0  ;;  %v1070_v4 = vmax.f32 %v1006_v31, 0.0 }
 0x14c   : > { %v817_v33 = vmul.f32 %v740_v18, %v599_v25  ;;  %2107 = vmatprep.subr.bf16.mxu1 %v2106_v52  ;;  %v1071_v44 = vmax.f32 %v1007_v32, 0.0 }
 0x14d   : > { %v1008_v35 = vadd.f32 %v2787_v43, %v816_v62  ;;  %2109 = vmatpush1.bf16.msra.mxu1 %v2108_v29  ;;  %v952_v62 = vpop.permute.xlu0 %951 }
 0x14e   : > { %v1009_v55 = vadd.f32 %v2787_v43, %v817_v33  ;;  %v603_v30 = vpop.f32.mrb[52].mxu0 }
 0x14f   : > { %v1072_v48 = vmax.f32 %v1008_v35, 0.0  ;;  %v818_v50 = vmul.f32 %v744_v38, %v603_v30  ;;  %v605_v39 = vpop.f32.mrb[53].mxu0 }
 0x150   : > { %v1073_v61 = vmax.f32 %v1009_v55, 0.0  ;;  %v819_v63 = vmul.f32 %v744_v38, %v605_v39 }
 0x151   : > { %v2112_v53 = vpack.c.bf16 %v1072_v48, %v1070_v4  ;;  %v1010_v3 = vadd.f32 %v2656_v59, %v818_v50 }
 0x152   : > { %v609_v1 = vpop.f32.mrb[54].mxu0  ;;  %v2110_v21 = vpack.c.bf16 %v1073_v61, %v1071_v44  ;;  %v1011_v5 = vadd.f32 %v2656_v59, %v819_v63 }
 0x153   : > { %v820_v19 = vmul.f32 %v2791_v51, %v609_v1  ;;  %v611_v54 = vpop.f32.mrb[55].mxu0  ;;  %v1074_v28 = vmax.f32 %v1010_v3, 0.0 }
 0x154   : > { %v821_v43 = vmul.f32 %v2791_v51, %v611_v54  ;;  %2111 = vmatprep.subr.bf16.mxu1 %v2110_v21  ;;  %v1075_v15 = vmax.f32 %v1011_v5, 0.0  ;;  %v1196_v5 = vpop.permute.xlu0 %1195 }
 0x155   : > { %v1012_v7 = vadd.f32 %v940_v56, %v820_v19  ;;  %2113 = vmatpush1.bf16.msra.mxu1 %v2112_v53  ;;  %v2286_v19 = vld [vmem:[%s2372_s30] sm:$0xff]  ;;  %s2306_s30 = smov 102  }
 0x156   : > { %v1013_v8 = vadd.f32 %v940_v56, %v821_v43  ;;  %v615_v10 = vpop.f32.mrb[56].mxu0  ;;  %v956_v56 = vpop.permute.xlu1 %955 }
 0x157   : > { %v1076_v41 = vmax.f32 %v1012_v7, 0.0  ;;  %v822_v37 = vmul.f32 %v752_v46, %v615_v10  ;;  %v617_v14 = vpop.f32.mrb[57].mxu0 }
 0x158   : > { %v1077_v16 = vmax.f32 %v1013_v8, 0.0  ;;  %v823_v17 = vmul.f32 %v752_v46, %v617_v14  ;;  %v2304_v8 = vmov 0.0|0.0  }
 0x159   : > { %v2116_v47 = vpack.c.bf16 %v1076_v41, %v1074_v28  ;;  %v1014_v59 = vadd.f32 %v944_v34, %v822_v37  ;;  %v1167_v37 = vlaneseq }
 0x15a   : > { %v621_v58 = vpop.f32.mrb[58].mxu0  ;;  %v2114_v20 = vpack.c.bf16 %v1077_v16, %v1075_v15  ;;  %v1015_v24 = vadd.f32 %v944_v34, %v823_v17  ;;  %v2244_v25 = vpop.permute.xlu1 %2243 }
 0x15b   : > { %v824_v22 = vmul.f32 %v756_v12, %v621_v58  ;;  %v623_v51 = vpop.f32.mrb[59].mxu0  ;;  %v1078_v60 = vmax.f32 %v1014_v59, 0.0  ;;  %v2246_v30 = vunpack.i.h.bf16 %v2244_v25  ;;  %v2245_v4 = vunpack.i.l.bf16 %v2244_v25 }
 0x15c   : > { %v825_v49 = vmul.f32 %v756_v12, %v623_v51  ;;  %2115 = vmatprep.subr.bf16.mxu1 %v2114_v20  ;;  %v1079_v46 = vmax.f32 %v1015_v24, 0.0  ;;  %v1086_v12 = vld [vmem:[%s2942_s2] sm:$0xff]  ;;  %v1168_v15 = vand.u32 127, %v1167_v37 }
 0x15d   : > { %v1016_v26 = vadd.f32 %v948_v2, %v824_v22  ;;  %2117 = vmatpush1.bf16.msra.mxu1 %v2116_v47  ;;  %v1193_v53 = vsel %vm1192_vm1, %v2245_v4, %v2246_v30 }
 0x15e   : > { %v1017_v18 = vadd.f32 %v948_v2, %v825_v49  ;;  %v627_v27 = vpop.f32.mrb[60].mxu0  ;;  %v2126_v54 = vpack.c.bf16 %v1193_v53, %v2286_v19  ;;  %v1198_v43 = vpop.permute.xlu1 %1197  ;;  %v1169_v16 = vadd.s32 128, %v1168_v15  ;;  %vm1170_vm5 = vcmp.ge.s32.totalorder %v1168_v15, 8 }
 0x15f   : > { %v1080_v57 = vmax.f32 %v1016_v26, 0.0  ;;  %v826_v29 = vmul.f32 %v760_v23, %v627_v27  ;;  %v629_v42 = vpop.f32.mrb[61].mxu0  ;;  %v1200_v7 = vsel %vm1199_vm2, %v1196_v5, %v1198_v43  ;;  %v1915_v22 = vsel %vm1170_vm5, 1.0, %v2295_v0 }
 0x160   : > { %v1081_v52 = vmax.f32 %v1017_v18, 0.0  ;;  %v827_v31 = vmul.f32 %v760_v23, %v629_v42  ;;  %vm1173_vm6 = vcmp.lt.s32.totalorder %v1169_v16, 136 }
 0x161   : > { %v2120_v32 = vpack.c.bf16 %v1080_v57, %v1078_v60  ;;  %v1018_v34 = vadd.f32 %v952_v62, %v826_v29  ;;  %v1916_v24 = vsel %vm1173_vm6, 1.0, %v2295_v0 }
 0x162   : > { %v633_v33 = vpop.f32.mrb[62].mxu0  ;;  %v2118_v35 = vpack.c.bf16 %v1081_v52, %v1079_v46  ;;  %v1019_v48 = vadd.f32 %v952_v62, %v827_v31 }
 0x163   : > { %v828_v38 = vmul.f32 %v764_v11, %v633_v33  ;;  %v635_v55 = vpop.f32.mrb[63].mxu0  ;;  %v1082_v61 = vmax.f32 %v1018_v34, 0.0 }
 0x164   : > { %v829_v50 = vmul.f32 %v764_v11, %v635_v55  ;;  %2119 = vmatprep.subr.bf16.mxu1 %v2118_v35  ;;  %v1083_v1 = vmax.f32 %v1019_v48, 0.0 }
 0x165   : > { %v1020_v39 = vadd.f32 %v956_v56, %v828_v38  ;;  %2121 = vmatpush1.bf16.msra.mxu1 %v2120_v32 }
 0x166   : > { %v1021_v44 = vadd.f32 %v956_v56, %v829_v50 }
 0x167   : > { %v1084_v63 = vmax.f32 %v1020_v39, 0.0 }
 0x168   : > { %v1085_v21 = vmax.f32 %v1021_v44, 0.0 }
 0x169   : > { %v2124_v2 = vpack.c.bf16 %v1084_v63, %v1082_v61 }
 0x16a   : > { %v2122_v3 = vpack.c.bf16 %v1085_v21, %v1083_v1 }
 0x16c   : > { %2123 = vmatprep.subr.bf16.mxu1 %v2122_v3 }
 0x16d   : > { %2125 = vmatpush1.bf16.msra.mxu1 %v2124_v2 }
 0x16e   : > { %2127 = vmatprep.subr.bf16.mxu1 %v2126_v54 }
 0x16f   : > { %v1306_v10 = vpop.permute.xlu1 %1305  ;;  %v1302_v58 = vpop.permute.xlu0 %1301 }
 0x170   : > { %1159 = vmatmul.mubr.f32.vlgmr.msra.gmra.mrb[0].mxu1 %v1086_v12 }
 0x171   : > { %2129 = vmatpush3.bf16.msra.mxu1 %v2126_v54  ;;  %1982 = vmatprep.mubr.msk.f32.mxu1 %vm1202_vm3, %v2693_v13 }
 0x172   : > { %1980 = vmatprep.subr.mxu1 %v1200_v7 }
 0x175   : > { %1981 = vmatpush3.msra.mxu1 %v1200_v7 }
 0x176   : > { %1983 = vmatmul.mubr.msk.f32.vlgmr.msra.gmra.mrb[2].mxu1 %vm1202_vm3, %v2687_v9  ;;  %2130 = vmatprep.subr.bf16.mxu1 %v2304_v8  ;;  %v1322_v11 = vpop.permute.xlu1 %1321  ;;  %v1326_v27 = vpop.permute.xlu0 %1325 }
 0x177   : > { %1985 = vmatprep.mubr.msk.f32.mxu1 %vm1202_vm3, %v2713_v36 }
 0x17a   : > { %1986 = vmatmul.mubr.msk.f32.gmra.mrb[4].mxu1 %vm1202_vm3, %v2725_v45  ;;  %v1330_v4 = vpop.permute.xlu0 %1329 }
 0x17b   : > { %1996 = vmatprep.mubr.msk.f32.mxu1 %vm2305_vm4, %v2295_v0  ;;  %v1310_v28 = vpop.permute.xlu1 %1309 }
 0x17f   : > { %v1348_v1 = vpop.permute.xlu0 %1347 }
 0x186   : > { %v1314_v41 = vpop.permute.xlu1 %1313 }
 0x18b   : > { %v1334_v14 = vpop.permute.xlu1 %1333 }
 0x190   : > { %v1092_v17 = vpop.permute.xlu1 %1091 }
 0x243   : > { %v1160_v47 = vpop.f32.mrb[0].mxu1 }
 0x244   : > { %v1161_v20 = vadd.f32 %v1160_v47, %v1092_v17  ;;  %v1162_v59 = vpop.f32.mrb[1].mxu1 }
 0x245   : > { %v1163_v51 = vadd.f32 %v1162_v59, %v1092_v17 }
 0x246   : > { %v1165_v23 = vmax.f32 %v1161_v20, 0.0 }
 0x247   : > { %v1166_v49 = vmax.f32 %v1163_v51, 0.0 }
 0x248   : > { %v2828_v56 = vmul.f32 %v1915_v22, %v1165_v23  ;;  %v2308_v23 = vmov 53  }
 0x249   : > { %v2830_v26 = vmul.f32 %v1916_v24, %v1166_v49  ;;  %v1984_v18 = vpop.f32.mrb[2].mxu1  ;;  %2276 = vset.pattern.permute.xlu1 %v2308_v23  ;;  %2275 = vset.pattern.permute.xlu0 %v2308_v23  ;;  %v2309_v24 = vmov 54  }
 0x24a   : > { %v1317_v60 = vmul.f32 %v1984_v18, %v1306_v10  ;;  %v1281_v57 = vpop.f32.mrb[3].mxu1  ;;  %v1435_v29 = vrot.slane %v2828_v56, 7  ;;  %v1454_v33 = vrot.slane %v2828_v56, 6 }
 0x24b   : > { %v1436_v42 = vrot.slane %v2830_v26, 7  ;;  %v1316_v46 = vmul.f32 %v1302_v58, %v1281_v57  ;;  %v1455_v31 = vrot.slane %v2830_v26, 6 }
 0x24c   : > { %v1337_v52 = vadd.f32 %v1326_v27, %v1317_v60 }
 0x24d   : > { %v1336_v62 = vadd.f32 %v1322_v11, %v1316_v46  ;;  %v1987_v25 = vpop.f32.mrb[4].mxu1  ;;  %v2255_v32 = vpack.i.bf16 %v1436_v42, %v1435_v29  ;;  %v2260_v44 = vpack.i.bf16 %v1455_v31, %v1454_v33 }
 0x24e   : > { %v1341_v35 = vmax.f32 %v1337_v52, 0.0  ;;  %v1319_v34 = vmul.f32 %v1987_v25, %v1314_v41  ;;  %v1291_v38 = vpop.f32.mrb[5].mxu1  ;;  %v1625_v25 = vld [vmem:[%s2945_s5 + $0x18] sm:$0xff] }
 0x24f   : > { %v1340_v55 = vmax.f32 %v1336_v62, 0.0  ;;  %v1318_v30 = vmul.f32 %v1310_v28, %v1291_v38  ;;  %2256 = vrot.lane.b32.xlu0 %v2255_v32, %s2299_s28  ;;  %v1624_v62 = vld [vmem:[%s2945_s5 + $0x10] sm:$0xff] }
 0x250   : > { %v1339_v48 = vadd.f32 %v1334_v14, %v1319_v34  ;;  %v1627_v34 = vld [vmem:[%s2945_s5 + $0x28] sm:$0xff] }
 0x251   : > { %v2131_v50 = vpack.c.bf16 %v1341_v35, %v1340_v55  ;;  %v1338_v39 = vadd.f32 %v1330_v4, %v1318_v30  ;;  %v1626_v35 = vld [vmem:[%s2945_s5 + $0x20] sm:$0xff]  ;;  %v1628_v30 = vld [vmem:[%s2945_s5 + $0x30] sm:$0xff]  ;;  %v1629_v4 = vld [vmem:[%s2945_s5 + $0x38] sm:$0xff] }
 0x252   : > { %v1343_v61 = vmax.f32 %v1339_v48, 0.0  ;;  %v2154_v55 = vpack.c.bf16 %v1627_v34, %v1626_v35  ;;  %v2158_v48 = vpack.c.bf16 %v1629_v4, %v1628_v30 }
 0x253   : > { %v1342_v63 = vmax.f32 %v1338_v39, 0.0  ;;  %2132 = vmatpush3.bf16.msra.mxu1 %v2131_v50  ;;  %2261 = vrot.lane.b32.xlu0 %v2260_v44, %s2298_s25  ;;  %v1630_v50 = vld [vmem:[%s2945_s5 + $0x40] sm:$0xff]  ;;  %v1631_v39 = vld [vmem:[%s2945_s5 + $0x48] sm:$0xff] }
 0x254   : > { %2133 = vmatprep.subr.bf16.mxu1 %v2304_v8  ;;  %v2162_v44 = vpack.c.bf16 %v1631_v39, %v1630_v50 }
 0x255   : > { %v2134_v53 = vpack.c.bf16 %v1343_v61, %v1342_v63  ;;  %v1632_v61 = vld [vmem:[%s2945_s5 + $0x50] sm:$0xff]  ;;  %v1633_v63 = vld [vmem:[%s2945_s5 + $0x58] sm:$0xff] }
 0x257   : > { %2135 = vmatpush3.bf16.msra.mxu1 %v2134_v53  ;;  %1473 = vrot.lane.b32.xlu0 %v2693_v13, %s2306_s30  ;;  %v2166_v53 = vpack.c.bf16 %v1633_v63, %v1632_v61 }
 0x25a   : > { %1997 = vmatmul.mubr.msk.f32.vlgmr.msra.gmra.mrb[6].mxu1 %vm1350_vm7, %v2730_v6 }
 0x25b   : > { %1477 = vrot.lane.b32.xlu0 %v2713_v36, %s2306_s30 }
 0x25f   : > { %1579 = vperm.xlu0 %2275, %v2693_v13  }
 0x263   : > { %2278 = vset.pattern.permute.xlu0 %v2309_v24 }
 0x264   : > { %1603 = vperm.xlu0 %2278, %v2687_v9  }
 0x268   : > { %1607 = vperm.xlu0 %2278, %v2713_v36  }
 0x26c   : > { %2281 = vset.pattern.permute.xlu0 %v2302_v40 }
 0x2c1   : > { %v2257_v54 = vpop.permute.xlu0 %2256 }
 0x2c2   : > { %v2259_v5 = vunpack.i.h.bf16 %v2257_v54  ;;  %v2258_v43 = vunpack.i.l.bf16 %v2257_v54 }
 0x2c4   : > { %v1449_v11 = vsel %vm1192_vm1, %v2258_v43, %v2259_v5 }
 0x2c5   : > { %v2262_v12 = vpop.permute.xlu0 %2261 }
 0x2c6   : > { %v2264_v18 = vunpack.i.h.bf16 %v2262_v12  ;;  %v2263_v27 = vunpack.i.l.bf16 %v2262_v12 }
 0x2c9   : > { %v1474_v58 = vpop.permute.xlu0 %1473 }
 0x2ca   : > { %2007 = vmatprep.mubr.msk.f32.mxu1 %vm1481_vm10, %v1474_v58 }
 0x2cd   : > { %v1478_v32 = vpop.permute.xlu0 %1477 }
 0x32d   : > { %v1419_v21 = vpop.f32.mrb[6].mxu1 }
 0x32e   : > { %v1420_v2 = vadd.f32 %v1419_v21, %v1348_v1  ;;  %v1998_v3 = vpop.f32.mrb[7].mxu1  ;;  %v1634_v1 = vld [vmem:[%s2945_s5 + $0x60] sm:$0xff]  ;;  %v1635_v21 = vld [vmem:[%s2945_s5 + $0x68] sm:$0xff] }
 0x32f   : > { %v1636_v3 = vld [vmem:[%s2945_s5 + $0x70] sm:$0xff] }
 0x330   : > { %v1423_v19 = vmax.f32 %v1420_v2, 0.0  ;;  %v2170_v2 = vpack.c.bf16 %v1635_v21, %v1634_v1 }
 0x332   : > { %1425 = vrot.lane.b32.xlu1 %v1423_v19, %s2307_s24  ;;  %v1637_v19 = vld [vmem:[%s2945_s5 + $0x78] sm:$0xff] }
 0x333   : > { %v2174_v54 = vpack.c.bf16 %v1637_v19, %v1636_v3 }
 0x3a4   : > { %v1426_v6 = vpop.permute.xlu1 %1425 }
 0x3a5   : > { %v1428_v7 = vsel %vm284_vm0, 0.0, %v1426_v6  ;;  %v1429_v10 = vsel %vm284_vm0, %v1426_v6, 0.0  ;;  %v1580_v6 = vpop.permute.xlu0 %1579 }
 0x3a6   : > { %v1437_v28 = vrot.slane %v1428_v7, 7  ;;  %v1439_v41 = vrot.slane %v1429_v10, 7  ;;  %v1456_v37 = vrot.slane %v1428_v7, 6  ;;  %v1458_v14 = vrot.slane %v1429_v10, 6 }
 0x3a7   : > { %v1471_v15 = vsel %vm1434_vm8, %v1428_v7, %v1449_v11 }
 0x3a8   : > { %v2136_v16 = vpack.c.bf16 %v1471_v15, %v2828_v56  ;;  %v1438_v17 = vsel %vm1434_vm8, %v1435_v29, %v1437_v28  ;;  %v1440_v47 = vsel %vm1434_vm8, %v1436_v42, %v1439_v41  ;;  %v1459_v59 = vsel %vm1453_vm9, %v1455_v31, %v1458_v14 }
 0x3a9   : > { %v2265_v20 = vpack.i.bf16 %v1440_v47, %v1438_v17  ;;  %v1457_v22 = vsel %vm1453_vm9, %v1454_v33, %v1456_v37  ;;  %v2150_v33 = vpack.c.bf16 %v1625_v25, %v1624_v62  ;;  %v1604_v11 = vpop.permute.xlu0 %1603 }
 0x3aa   : > { %2137 = vmatprep.subr.bf16.mxu1 %v2136_v16  ;;  %v2270_v51 = vpack.i.bf16 %v1459_v59, %v1457_v22 }
 0x3ab   : > { %2139 = vmatpush3.bf16.msra.mxu1 %v2136_v16  ;;  %2266 = vrot.lane.b32.xlu1 %v2265_v20, %s2299_s28 }
 0x3af   : > { %2271 = vrot.lane.b32.xlu1 %v2270_v51, %s2298_s25  ;;  %v1608_v51 = vpop.permute.xlu0 %1607 }
 0x3b3   : > { %1475 = vrot.lane.b32.xlu1 %v2687_v9, %s2306_s30 }
 0x3b7   : > { %1479 = vrot.lane.b32.xlu1 %v2725_v45, %s2306_s30 }
 0x3bb   : > { %1583 = vperm.xlu1 %2276, %v2687_v9  }
 0x3bf   : > { %2277 = vset.pattern.permute.xlu1 %v2309_v24 }
 0x3c0   : > { %1599 = vperm.xlu1 %2277, %v2693_v13   ;;  %v1622_v13 = vld [vmem:[%s2945_s5] sm:$0xff] }
 0x3c4   : > { %2279 = vset.pattern.permute.xlu1 %v2308_v23 }
 0x3c5   : > { %1587 = vperm.xlu1 %2279, %v2713_v36   ;;  %v1623_v36 = vld [vmem:[%s2945_s5 + $0x8] sm:$0xff] }
 0x3c6   : > { %v2146_v52 = vpack.c.bf16 %v1623_v36, %v1622_v13 }
 0x3c9   : > { %1591 = vperm.xlu1 %2279, %v2725_v45  }
 0x3cd   : > { %2280 = vset.pattern.permute.xlu1 %v2309_v24 }
 0x3ce   : > { %1611 = vperm.xlu1 %2280, %v2725_v45   ;;  %v1468_v45 = vsel %vm1199_vm2, %v2263_v27, %v2264_v18 }
 0x41d   : > { %v2267_v49 = vpop.permute.xlu1 %2266 }
 0x41e   : > { %v2269_v56 = vunpack.i.h.bf16 %v2267_v49  ;;  %v2268_v26 = vunpack.i.l.bf16 %v2267_v49 }
 0x420   : > { %v1450_v9 = vsel %vm1192_vm1, %v2268_v26, %v2269_v56  ;;  %v1723_v26 = vld [vmem:[%s2944_s4] sm:$0xf] }
 0x421   : > { %v2272_v60 = vpop.permute.xlu1 %2271  ;;  %v1472_v42 = vsel %vm1453_vm9, %v1450_v9, %v1468_v45  ;;  %1726 = vperm.xlu0 %2281, %v1723_v26  }
 0x422   : > { %v2274_v40 = vunpack.i.h.bf16 %v2272_v60  ;;  %v2273_v57 = vunpack.i.l.bf16 %v2272_v60 }
 0x424   : > { %v1469_v29 = vsel %vm1199_vm2, %v2273_v57, %v2274_v40 }
 0x425   : > { %v2140_v46 = vpack.c.bf16 %v1469_v29, %v1472_v42  ;;  %v1476_v31 = vpop.permute.xlu1 %1475 }
 0x427   : > { %2142 = vmatprep.subr.msk.bf16.mxu1 %vm2141_vm13, %v2140_v46 }
 0x428   : > { %2145 = vmatpush3.bf16.msk.msra.mxu1 %vm2141_vm13, %v2140_v46 }
 0x429   : > { %2147 = vmatprep.subr.bf16.mxu1 %v2146_v52  ;;  %v1480_v38 = vpop.permute.xlu1 %1479 }
 0x42b   : > { %2008 = vmatmul.mubr.msk.f32.vlgmr.msra.gmra.mrb[8].mxu1 %vm1481_vm10, %v1476_v31 }
 0x42c   : > { %2010 = vmatprep.mubr.msk.f32.mxu1 %vm1481_vm10, %v1478_v32  ;;  %2149 = vmatpush3.bf16.msra.mxu1 %v2146_v52 }
 0x42d   : > { %2151 = vmatprep.subr.bf16.mxu1 %v2150_v33 }
 0x42f   : > { %2011 = vmatmul.mubr.msk.f32.gmra.mrb[10].mxu1 %vm1481_vm10, %v1480_v38 }
 0x430   : > { %2153 = vmatpush3.bf16.msra.mxu1 %v2150_v33 }
 0x431   : > { %2155 = vmatprep.subr.bf16.mxu1 %v2154_v55 }
 0x434   : > { %2157 = vmatpush3.bf16.msra.mxu1 %v2154_v55 }
 0x435   : > { %2159 = vmatprep.subr.bf16.mxu1 %v2158_v48 }
 0x438   : > { %2161 = vmatpush3.bf16.msra.mxu1 %v2158_v48 }
 0x439   : > { %2163 = vmatprep.subr.bf16.mxu1 %v2162_v44 }
 0x43a   : > { %v1584_v5 = vpop.permute.xlu1 %1583 }
 0x43c   : > { %2165 = vmatpush3.bf16.msra.mxu1 %v2162_v44 }
 0x43d   : > { %2167 = vmatprep.subr.bf16.mxu1 %v2166_v53 }
 0x43f   : > { %v1600_v43 = vpop.permute.xlu1 %1599 }
 0x440   : > { %2169 = vmatpush3.bf16.msra.mxu1 %v2166_v53 }
 0x441   : > { %2171 = vmatprep.subr.bf16.mxu1 %v2170_v2 }
 0x444   : > { %2173 = vmatpush3.bf16.msra.mxu1 %v2170_v2  ;;  %v1588_v12 = vpop.permute.xlu1 %1587 }
 0x445   : > { %2175 = vmatprep.subr.bf16.mxu1 %v2174_v54 }
 0x448   : > { %2177 = vmatpush3.bf16.msra.mxu1 %v2174_v54  ;;  %v1592_v7 = vpop.permute.xlu1 %1591 }
 0x449   : > { %2178 = vmatprep.subr.bf16.mxu1 %v2304_v8 }
 0x44d   : > { %v1612_v17 = vpop.permute.xlu1 %1611 }
 0x4a0   : > { %v1727_v13 = vpop.permute.xlu0 %1726 }
 0x4fe   : > { %v2009_v10 = vpop.f32.mrb[8].mxu1 }
 0x4ff   : > { %v1595_v28 = vmul.f32 %v2009_v10, %v1584_v5  ;;  %v1559_v41 = vpop.f32.mrb[9].mxu1 }
 0x500   : > { %v1594_v37 = vmul.f32 %v1580_v6, %v1559_v41 }
 0x501   : > { %v1615_v14 = vadd.f32 %v1604_v11, %v1595_v28 }
 0x502   : > { %v1614_v15 = vadd.f32 %v1600_v43, %v1594_v37  ;;  %v2012_v16 = vpop.f32.mrb[10].mxu1 }
 0x503   : > { %v1597_v47 = vmul.f32 %v2012_v16, %v1592_v7  ;;  %v1569_v58 = vpop.f32.mrb[11].mxu1  ;;  %v1619_v22 = vmax.f32 %v1615_v14, 0.0 }
 0x504   : > { %v1618_v20 = vmax.f32 %v1614_v15, 0.0  ;;  %v1596_v59 = vmul.f32 %v1588_v12, %v1569_v58 }
 0x505   : > { %v1617_v23 = vadd.f32 %v1612_v17, %v1597_v47 }
 0x506   : > { %v1616_v24 = vadd.f32 %v1608_v51, %v1596_v59  ;;  %2045 = vmatprep.mubr.f32.mxu1 %v1618_v20 }
 0x507   : > { %2046 = vmatmul.mubr.f32.vlgmr.msra.gmra.mrb[12].mxu1 %v1619_v22  ;;  %v1621_v56 = vmax.f32 %v1617_v23, 0.0 }
 0x508   : > { %v1620_v49 = vmax.f32 %v1616_v24, 0.0 }
 0x50a   : > { %2048 = vmatprep.mubr.f32.mxu1 %v1620_v49 }
 0x50b   : > { %2049 = vmatmul.mubr.f32.gmra.mrb[14].mxu1 %v1621_v56 }
 0x50c   : > { %2059 = vmatprep.mubr.msk.f32.mxu1 %vm2305_vm4, %v2295_v0 }
 0x5da   : > { %v2047_v18 = vpop.f32.mrb[12].mxu1 }
 0x5db   : > { %v1704_v27 = vpop.f32.mrb[13].mxu1 }
 0x5dc   : > { %v2179_v9 = vpack.c.bf16 %v2047_v18, %v1704_v27 }
 0x5de   : > { %v2050_v60 = vpop.f32.mrb[14].mxu1  ;;  %2180 = vmatpush3.bf16.msra.mxu1 %v2179_v9 }
 0x5df   : > { %v1714_v40 = vpop.f32.mrb[15].mxu1  ;;  %2181 = vmatprep.subr.bf16.mxu1 %v2304_v8 }
 0x5e0   : > { %v2182_v57 = vpack.c.bf16 %v2050_v60, %v1714_v40 }
 0x5e2   : > { %2183 = vmatpush3.bf16.msra.mxu1 %v2182_v57 }
 0x5e5   : > { %2060 = vmatmul.mubr.msk.f32.vlgmr.msra.gmra.mrb[16].mxu1 %vm1350_vm7, %v1723_v26 }
 0x6b8   : > { %v1797_v36 = vpop.f32.mrb[16].mxu1 }
 0x6b9   : > { %v1798_v0 = vadd.f32 %v1797_v36, %v1727_v13  ;;  %v2061_v45 = vpop.f32.mrb[17].mxu1 }
 0x6bb   : > { %v1802_v29 = vsel %vm1801_vm14, %v1798_v0, -inf }
 0x6bc   : > { %v1803_v42 = vrot.slane %v1802_v29, 4 }
 0x6be   : > { %v1804_v46 = vmax.f32 %v1802_v29, %v1803_v42 }
 0x6c0   : > { %v1805_v52 = vrot.slane %v1804_v46, 2 }
 0x6c2   : > { %v1806_v31 = vmax.f32 %v1804_v46, %v1805_v52 }
 0x6c4   : > { %v1807_v62 = vrot.slane %v1806_v31, 1 }
 0x6c6   : > { %v1808_v25 = vmax.f32 %v1806_v31, %v1807_v62 }
 0x6c8   : > { %v1809_v32 = vsub.f32 %v1798_v0, %v1808_v25 }
 0x6ca   : > { %v1810_v8 = vmul.f32 1.442695, %v1809_v32 }
 0x6cc   : > { %2282 = vpow2.f32 %v1810_v8 }
 0x6d6   : > { %v2283_v33 = vpop.eup %2282 }
 0x6d7   : > { %v1812_v35 = vsel %vm1801_vm14, %v2283_v33, 0.0 }
 0x6d8   : > { %v1813_v34 = vrot.slane %v1812_v35, 4 }
 0x6da   : > { %v1814_v38 = vadd.f32 %v1813_v34, %v1812_v35 }
 0x6dc   : > { %v1815_v55 = vrot.slane %v1814_v38, 2 }
 0x6de   : > { %v1816_v30 = vadd.f32 %v1815_v55, %v1814_v38 }
 0x6e0   : > { %v1817_v4 = vrot.slane %v1816_v30, 1 }
 0x6e2   : > { %v1818_v48 = vadd.f32 %v1817_v4, %v1816_v30 }
 0x6e4   : > { %2284 = vrcp.f32 %v1818_v48 }
 0x6ee   : > { %v2285_v50 = vpop.eup %2284 }
 0x6ef   : > { %v1820_v39 = vmul.f32 %v2285_v50, %v2283_v33 }
 0x6f1   : > { %1821 = vst.msk [vmem:[%s249_s17] sm:$0xf] %vm1801_vm14, %v1820_v39 }
 0x6f2 PF: > { %s16_s21 = sadd.s32 1, %s2293_s21  }
 0x6f3   : > { %p13_p4 = scmp.ge.s32.totalorder %s16_s21, 4  }
 0x6f5   :  { %15 = sbr.rel (!%p13_p4) target bundleno = 1 (0x1), region = 74 }

</bundles_post_ra>
